<compile_context>
chip_gen: v7x
topology: tpu7x:2x2x1
jax: 0.10.0
libtpu: 0.0.40
codegen_flags: <defaults>
</compile_context>

<pallas_src>
import functools

import jax
import jax.numpy as jnp
from jax import lax
from jax.experimental import pallas as pl
from jax.experimental.pallas import tpu as pltpu


def _round_up(a, m):
    return (a + m - 1) // m * m


# ------------------------------ Pallas kernel ------------------------------- #
def _stack_kernel(x_ref, w_ih_ref, w_hh_ref, b_ref,
                  xout_ref, res_ref, gx_ref,
                  *, T, BB, H, unroll, weights_resident):
    """One grid step = one LSTM layer applied to one batch block.

    grid = (num_batch_blocks, num_layers); layer axis runs sequentially.

    x_ref    : (T, BB, H)        time-major input X (consumed at layer 0 only)
    w_ih_ref : (L, H, 4H) bf16   resident weights, or (1, H, 4H) streamed
    w_hh_ref : same as w_ih_ref
    b_ref    : (L, 1, 4H) f32    combined biases (b_ih + b_hh), resident
    xout_ref : (T, BB, H)  f32   residual X, accumulated in place across layers
    res_ref  : (T, BB, H)  f32   sum of layer outputs, accumulated in place
    gx_ref   : (T, BB, 4H) bf16  VMEM scratch: X @ W_ih + b for this layer
    """
    layer = pl.program_id(1)

    @pl.when(layer == 0)
    def _():
        xout_ref[...] = x_ref[...].astype(jnp.float32)
        res_ref[...] = jnp.zeros_like(res_ref)

    if weights_resident:
        w_ih = w_ih_ref[layer]          # (H, 4H) bf16
        w_hh = w_hh_ref[layer]          # (H, 4H) bf16
    else:
        w_ih = w_ih_ref[0]
        w_hh = w_hh_ref[0]
    bias = b_ref[layer]                 # (1, 4H) f32

    # Non-recurrent matmul hoisted out of the recurrence: one MXU GEMM for the
    # whole time slab (bf16 inputs, f32 accumulation), bias folded in.
    # (T, BB, H) -> (T*BB, H) is layout-free because BB is a multiple of 8.
    x_flat = xout_ref[...].reshape(T * BB, H).astype(jnp.bfloat16)
    gates_x = jnp.dot(x_flat, w_ih, preferred_element_type=jnp.float32) + bias
    gx_ref[...] = gates_x.reshape(T, BB, 4 * H).astype(jnp.bfloat16)

    # Column mask selecting the g (cell candidate) gate; hoisted out of the
    # time loop (JAX does not CSE broadcasts).
    col = lax.broadcasted_iota(jnp.int32, (BB, 4 * H), 1)
    is_g = (col >= 2 * H) & (col < 3 * H)

    def step(t, carry):
        h, c = carry                                        # f32 (BB, H)
        g_rec = jnp.dot(h.astype(jnp.bfloat16), w_hh,
                        preferred_element_type=jnp.float32)
        gates = gx_ref[t].astype(jnp.float32) + g_rec       # (BB, 4H) f32
        # One lane-dense tanh over the whole gate tile:
        #   sigmoid(x) = 0.5 * (1 + tanh(x/2)); tanh for the g gate.
        pre = jnp.where(is_g, gates, 0.5 * gates)
        tg = jnp.tanh(pre)
        act = jnp.where(is_g, tg, 0.5 * (tg + 1.0))
        i_g = act[:, 0 * H:1 * H]
        f_g = act[:, 1 * H:2 * H]
        g_g = act[:, 2 * H:3 * H]
        o_g = act[:, 3 * H:4 * H]
        c = f_g * c + i_g * g_g
        h = o_g * jnp.tanh(c)
        # Residual update and result accumulation fused into the recurrence;
        # safe because gx for this layer was computed from the old X.
        xout_ref[t] = xout_ref[t] - h
        res_ref[t] = res_ref[t] + h
        return h, c

    zeros = jnp.zeros((BB, H), jnp.float32)
    lax.fori_loop(0, T, step, (zeros, zeros), unroll=unroll)


# ------------------------------ Python wrapper ------------------------------ #
_BLOCK_ACT_BUDGET = 24 * 1024 * 1024        # per-batch-block activation VMEM
_WEIGHT_RESIDENT_BUDGET = 8 * 1024 * 1024   # keep all layers' weights in VMEM


def _block_act_bytes(T, BB, H, in_itemsize):
    gx = T * BB * 4 * H * 2                 # bf16 gx scratch (single buffer)
    outs = 2 * T * BB * H * 4 * 2           # two f32 output blocks (2 buffers)
    xin = T * BB * H * in_itemsize * 2      # input block (double-buffered)
    return gx + outs + xin


def stack_forward(x_bth, w_ih, w_hh, bias, *, block_batch=None):
    """x_bth: (B, T, H) batch-first like the PyTorch module.

    w_ih, w_hh: (L, H, 4H) per-layer weights, already transposed so the kernel
    computes x @ W (any float dtype; cast to bf16). bias: (L, 1, 4H) pre-summed
    b_ih + b_hh. Returns (X, result), both (B, T, H)."""
    B, T, H = x_bth.shape
    L = w_ih.shape[0]
    in_itemsize = jnp.dtype(x_bth.dtype).itemsize

    # ---- batch block size (sublane-aligned, VMEM-capped, NB>=2 if possible) --
    if block_batch is None:
        b_pad8 = _round_up(B, 8)
        bb = min(128, b_pad8)
        half = (b_pad8 // 2) // 8 * 8
        if half >= 8:
            bb = min(bb, half)              # keep >= 2 blocks for v7x megacore
        while bb > 8 and _block_act_bytes(T, bb, H, in_itemsize) > _BLOCK_ACT_BUDGET:
            bb -= 8
        BB = bb
    else:
        BB = _round_up(max(block_batch, 1), 8)
    B_pad = _round_up(B, BB)
    NB = B_pad // BB

    # ---- weights: bf16 MXU operands, VMEM-resident if they fit --------------
    w_ih = w_ih.astype(jnp.bfloat16)
    w_hh = w_hh.astype(jnp.bfloat16)
    bias = bias.astype(jnp.float32).reshape(L, 1, 4 * H)
    weight_bytes = 2 * L * H * 4 * H * 2
    weights_resident = weight_bytes <= _WEIGHT_RESIDENT_BUDGET

    if weights_resident:
        w_ih_spec = pl.BlockSpec((L, H, 4 * H), lambda nb, l: (0, 0, 0))
        w_hh_spec = pl.BlockSpec((L, H, 4 * H), lambda nb, l: (0, 0, 0))
    else:
        w_ih_spec = pl.BlockSpec((1, H, 4 * H), lambda nb, l: (l, 0, 0))
        w_hh_spec = pl.BlockSpec((1, H, 4 * H), lambda nb, l: (l, 0, 0))
    b_spec = pl.BlockSpec((L, 1, 4 * H), lambda nb, l: (0, 0, 0))

    # ---- explicit VMEM limit from the computed working set ------------------
    est = _block_act_bytes(T, BB, H, in_itemsize)
    est += (2 * weight_bytes if weights_resident else 2 * 2 * H * 4 * H * 2)
    est += L * 4 * H * 4
    try:
        vmem_cap = int(pltpu.get_tpu_info().vmem_capacity_bytes)
    except Exception:  # pragma: no cover - conservative fallback
        vmem_cap = 64 << 20
    vmem_limit = int(min(max(est + (4 << 20), 32 << 20), int(vmem_cap * 0.9)))

    # ---- bounded unroll to avoid vreg spills at large BB*H ------------------
    if BB * H <= 2048:
        unroll = 8
    elif BB * H <= 8192:
        unroll = 4
    else:
        unroll = 2
    unroll = min(unroll, T)

    # Batch-first -> time-major once for the whole fused stack, padding the
    # batch to BB sublanes. Padded rows compute junk and are sliced off below.
    x_tm = jnp.transpose(x_bth, (1, 0, 2))
    if B_pad != B:
        x_tm = jnp.pad(x_tm, ((0, 0), (0, B_pad - B), (0, 0)))

    kernel = functools.partial(_stack_kernel, T=T, BB=BB, H=H,
                               unroll=unroll, weights_resident=weights_resident)
    x_out_tm, res_tm = pl.pallas_call(
        kernel,
        out_shape=(jax.ShapeDtypeStruct((T, B_pad, H), jnp.float32),
                   jax.ShapeDtypeStruct((T, B_pad, H), jnp.float32)),
        grid_spec=pltpu.PrefetchScalarGridSpec(
            num_scalar_prefetch=0,
            grid=(NB, L),                                       # layers innermost
            in_specs=[
                pl.BlockSpec((T, BB, H), lambda nb, l: (0, nb, 0)),   # X
                w_ih_spec,                                            # W_ih
                w_hh_spec,                                            # W_hh
                b_spec,                                               # bias
            ],
            out_specs=[
                pl.BlockSpec((T, BB, H), lambda nb, l: (0, nb, 0)),   # X_out
                pl.BlockSpec((T, BB, H), lambda nb, l: (0, nb, 0)),   # result
            ],
            scratch_shapes=[
                pltpu.VMEM((T, BB, 4 * H), jnp.bfloat16),   # X@W_ih + b (bf16)
            ],
        ),
        compiler_params=pltpu.CompilerParams(
            dimension_semantics=("parallel", "arbitrary"),
            vmem_limit_bytes=vmem_limit),
    )(x_tm, w_ih, w_hh, bias)

    x_out = jnp.transpose(x_out_tm, (1, 0, 2))[:B].astype(x_bth.dtype)
    result = jnp.transpose(res_tm, (1, 0, 2))[:B].astype(x_bth.dtype)
    return x_out, result


# ---------------------------- Pure-JAX reference ---------------------------- #
def _lstm_layer_ref(x_tbh, w_ih_l, w_hh_l, bias_l):
    T, B, H = x_tbh.shape

    def step(carry, x_t):
        h, c = carry
        gates = x_t @ w_ih_l + h @ w_hh_l + bias_l
        i = jax.nn.sigmoid(gates[:, 0 * H:1 * H])
        f = jax.nn.sigmoid(gates[:, 1 * H:2 * H])
        g = jnp.tanh(gates[:, 2 * H:3 * H])
        o = jax.nn.sigmoid(gates[:, 3 * H:4 * H])
        c = f * c + i * g
        h = o * jnp.tanh(c)
        return (h, c), h

    init = (jnp.zeros((B, H), jnp.float32), jnp.zeros((B, H), jnp.float32))
    _, ys = jax.lax.scan(step, init, x_tbh)
    return ys


def stack_forward_ref(x_bth, w_ih, w_hh, bias):
    x = jnp.transpose(x_bth, (1, 0, 2)).astype(jnp.float32)
    w_ih = w_ih.astype(jnp.float32)
    w_hh = w_hh.astype(jnp.float32)
    bias = bias.astype(jnp.float32)
    result = jnp.zeros_like(x)
    for l in range(w_ih.shape[0]):
        y = _lstm_layer_ref(x, w_ih[l], w_hh[l], bias[l])
        result = result + y
        x = x - y
    return jnp.transpose(x, (1, 0, 2)), jnp.transpose(result, (1, 0, 2))


# ------------------------------ Param helpers ------------------------------- #
def init_params(key, hidden_size, num_layers):
    """Deterministic params matching nn.LSTM(hidden, hidden, 1) shapes.

    PyTorch stores weight_ih as (4H, H); we store the transpose (H, 4H) so the
    kernel computes x @ W_ih directly. Biases b_ih + b_hh are pre-summed."""
    bound = 1.0 / (hidden_size ** 0.5)
    keys = jax.random.split(key, 4 * num_layers)
    w_ih, w_hh, b = [], [], []
    for l in range(num_layers):
        k1, k2, k3, k4 = keys[4 * l:4 * l + 4]
        w_ih.append(jax.random.uniform(k1, (hidden_size, 4 * hidden_size),
                                       jnp.float32, -bound, bound))
        w_hh.append(jax.random.uniform(k2, (hidden_size, 4 * hidden_size),
                                       jnp.float32, -bound, bound))
        b_ih = jax.random.uniform(k3, (4 * hidden_size,), jnp.float32, -bound, bound)
        b_hh = jax.random.uniform(k4, (4 * hidden_size,), jnp.float32, -bound, bound)
        b.append((b_ih + b_hh).reshape(1, 4 * hidden_size))
    return jnp.stack(w_ih), jnp.stack(w_hh), jnp.stack(b)


# ---------------------------------- main ------------------------------------ #
if __name__ == "__main__":
    B, T, H = 2, 8, 32
    NUM_LAYERS = 4

    key = jax.random.PRNGKey(0)
    key, kx = jax.random.split(key)
    x = jax.random.normal(kx, (B, T, H), jnp.float32)
    w_ih, w_hh, bias = init_params(key, H, NUM_LAYERS)
    # The kernel consumes bf16 weights; round them once here and feed the same
    # rounded weights to the reference so the check isolates compute precision.
    w_ih = w_ih.astype(jnp.bfloat16)
    w_hh = w_hh.astype(jnp.bfloat16)

    fwd = jax.jit(stack_forward)
    x_out, result = fwd(x, w_ih, w_hh, bias)
    jax.block_until_ready((x_out, result))

    # Sanity check against the pure-JAX (f32 compute) reference. Tolerances
    # account for bf16 MXU operands / bf16 gx storage in the kernel.
    x_refv, res_refv = stack_forward_ref(x, w_ih, w_hh, bias)
    assert x_out.shape == (B, T, H) and result.shape == (B, T, H)
    assert jnp.allclose(x_out, x_refv, atol=3e-2, rtol=3e-2)
    assert jnp.allclose(result, res_refv, atol=3e-2, rtol=3e-2)

    print("KERNEL_OK")
</pallas_src>

<mosaic_0001>
module attributes {stable_mosaic.version = 11 : i64} {
  func.func @_stack_kernel(%arg0: i32, %arg1: i32, %arg2: memref<8x8x32xf32, #tpu.memory_space<vmem>>, %arg3: memref<4x32x128xbf16, #tpu.memory_space<vmem>>, %arg4: memref<4x32x128xbf16, #tpu.memory_space<vmem>>, %arg5: memref<4x1x128xf32, #tpu.memory_space<vmem>>, %arg6: memref<8x8x32xf32, #tpu.memory_space<vmem>>, %arg7: memref<8x8x32xf32, #tpu.memory_space<vmem>>, %arg8: memref<8x8x128xbf16, #tpu.memory_space<vmem>>) attributes {dimension_semantics = [#tpu.dimension_semantics<parallel>, #tpu.dimension_semantics<arbitrary>], iteration_bounds = array<i64: 1, 4>, scalar_prefetch = 0 : i64, scratch_operands = 1 : i64, tpu.core_type = #tpu.core_type<tc>, window_params = [{transform_indices = @transform_0, window_bounds = array<i64: 8, 8, 32>}, {pipeline_mode = #tpu.pipeline_mode<synchronous>, transform_indices = @transform_1, window_bounds = array<i64: 4, 32, 128>}, {pipeline_mode = #tpu.pipeline_mode<synchronous>, transform_indices = @transform_2, window_bounds = array<i64: 4, 32, 128>}, {pipeline_mode = #tpu.pipeline_mode<synchronous>, transform_indices = @transform_3, window_bounds = array<i64: 4, 1, 128>}, {transform_indices = @transform_4, window_bounds = array<i64: 8, 8, 32>}, {transform_indices = @transform_5, window_bounds = array<i64: 8, 8, 32>}]} {
    %c0_i32 = arith.constant 0 : i32
    %0 = arith.cmpi eq, %arg1, %c0_i32 : i32
    %1 = arith.extui %0 : i1 to i32
    %c0_i32_0 = arith.constant 0 : i32
    %2 = arith.cmpi ne, %1, %c0_i32_0 : i32
    scf.if %2 {
      %c0_126 = arith.constant 0 : index
      %c0_127 = arith.constant 0 : index
      %c0_128 = arith.constant 0 : index
      %356 = vector.load %arg2[%c0_126, %c0_127, %c0_128] : memref<8x8x32xf32, #tpu.memory_space<vmem>>, vector<8x8x32xf32>
      %c0_129 = arith.constant 0 : index
      %c0_130 = arith.constant 0 : index
      %c0_131 = arith.constant 0 : index
      %357 = vector.load %arg6[%c0_129, %c0_130, %c0_131] : memref<8x8x32xf32, #tpu.memory_space<vmem>>, vector<8x8x32xf32>
      tpu.vector_store %arg6[%c0_129, %c0_130, %c0_131], %356 {strides = array<i32>} : memref<8x8x32xf32, #tpu.memory_space<vmem>>, vector<8x8x32xf32>,
      %cst_132 = arith.constant 0.000000e+00 : f32
      %358 = vector.broadcast %cst_132 : f32 to vector<8x8x32xf32>
      %c0_133 = arith.constant 0 : index
      %c0_134 = arith.constant 0 : index
      %c0_135 = arith.constant 0 : index
      %359 = vector.load %arg7[%c0_133, %c0_134, %c0_135] : memref<8x8x32xf32, #tpu.memory_space<vmem>>, vector<8x8x32xf32>
      tpu.vector_store %arg7[%c0_133, %c0_134, %c0_135], %358 {strides = array<i32>} : memref<8x8x32xf32, #tpu.memory_space<vmem>>, vector<8x8x32xf32>,
    } else {
    }
    %3 = arith.index_cast %arg1 : i32 to index
    %c0 = arith.constant 0 : index
    %c0_1 = arith.constant 0 : index
    %4 = vector.load %arg3[%3, %c0, %c0_1] : memref<4x32x128xbf16, #tpu.memory_space<vmem>>, vector<1x32x128xbf16>
    %5 = vector.shape_cast %4 : vector<1x32x128xbf16> to vector<32x128xbf16>
    %6 = arith.index_cast %arg1 : i32 to index
    %c0_2 = arith.constant 0 : index
    %c0_3 = arith.constant 0 : index
    %7 = vector.load %arg4[%6, %c0_2, %c0_3] : memref<4x32x128xbf16, #tpu.memory_space<vmem>>, vector<1x32x128xbf16>
    %8 = vector.shape_cast %7 : vector<1x32x128xbf16> to vector<32x128xbf16>
    %9 = arith.index_cast %arg1 : i32 to index
    %c0_4 = arith.constant 0 : index
    %c0_5 = arith.constant 0 : index
    %10 = vector.load %arg5[%9, %c0_4, %c0_5] : memref<4x1x128xf32, #tpu.memory_space<vmem>>, vector<1x1x128xf32>
    %11 = vector.shape_cast %10 : vector<1x1x128xf32> to vector<1x128xf32>
    %c0_6 = arith.constant 0 : index
    %c0_7 = arith.constant 0 : index
    %c0_8 = arith.constant 0 : index
    %12 = vector.load %arg6[%c0_6, %c0_7, %c0_8] : memref<8x8x32xf32, #tpu.memory_space<vmem>>, vector<8x8x32xf32>
    %13 = vector.shape_cast %12 : vector<8x8x32xf32> to vector<64x32xf32>
    %14 = arith.truncf %13 : vector<64x32xf32> to vector<64x32xbf16>
    %cst = arith.constant dense<0.000000e+00> : vector<64x128xf32>
    %15 = tpu.matmul %14, %5, %cst {dimension_numbers = #tpu.dot_dimension_numbers<[1], [0], [0], [1], [0, 0, 1, 1], [], []>} : vector<64x32xbf16>, vector<32x128xbf16>, vector<64x128xf32> -> vector<64x128xf32>
    %16 = vector.broadcast %11 : vector<1x128xf32> to vector<64x128xf32>
    %17 = arith.addf %15, %16 : vector<64x128xf32>
    %18 = vector.shape_cast %17 : vector<64x128xf32> to vector<8x8x128xf32>
    %19 = arith.truncf %18 : vector<8x8x128xf32> to vector<8x8x128xbf16>
    %c0_9 = arith.constant 0 : index
    %c0_10 = arith.constant 0 : index
    %c0_11 = arith.constant 0 : index
    %20 = vector.load %arg8[%c0_9, %c0_10, %c0_11] : memref<8x8x128xbf16, #tpu.memory_space<vmem>>, vector<8x8x128xbf16>
    tpu.vector_store %arg8[%c0_9, %c0_10, %c0_11], %19 {strides = array<i32>} : memref<8x8x128xbf16, #tpu.memory_space<vmem>>, vector<8x8x128xbf16>,
    %21 = tpu.iota {dimensions = array<i32: 1>} : vector<8x128xi32>
    %c64_i32 = arith.constant 64 : i32
    %22 = vector.broadcast %c64_i32 : i32 to vector<8x128xi32>
    %23 = arith.cmpi sge, %21, %22 : vector<8x128xi32>
    %c96_i32 = arith.constant 96 : i32
    %24 = vector.broadcast %c96_i32 : i32 to vector<8x128xi32>
    %25 = arith.cmpi slt, %21, %24 : vector<8x128xi32>
    %26 = arith.andi %23, %25 : vector<8x128xi1>
    %cst_12 = arith.constant 0.000000e+00 : f32
    %27 = vector.broadcast %cst_12 : f32 to vector<8x32xf32>
    %c0_i32_13 = arith.constant 0 : i32
    %28 = arith.truncf %27 : vector<8x32xf32> to vector<8x32xbf16>
    %cst_14 = arith.constant dense<0.000000e+00> : vector<8x128xf32>
    %29 = tpu.matmul %28, %8, %cst_14 {dimension_numbers = #tpu.dot_dimension_numbers<[1], [0], [0], [1], [0, 0, 1, 1], [], []>} : vector<8x32xbf16>, vector<32x128xbf16>, vector<8x128xf32> -> vector<8x128xf32>
    %30 = arith.index_cast %c0_i32_13 : i32 to index
    %c0_15 = arith.constant 0 : index
    %c0_16 = arith.constant 0 : index
    %31 = vector.load %arg8[%30, %c0_15, %c0_16] : memref<8x8x128xbf16, #tpu.memory_space<vmem>>, vector<1x8x128xbf16>
    %32 = vector.shape_cast %31 : vector<1x8x128xbf16> to vector<8x128xbf16>
    %33 = arith.extf %32 : vector<8x128xbf16> to vector<8x128xf32>
    %34 = arith.addf %33, %29 : vector<8x128xf32>
    %cst_17 = arith.constant 5.000000e-01 : f32
    %35 = vector.broadcast %cst_17 : f32 to vector<8x128xf32>
    %36 = arith.mulf %35, %34 : vector<8x128xf32>
    %37 = arith.select %26, %34, %36 : vector<8x128xi1>, vector<8x128xf32>
    %38 = math.tanh %37 : vector<8x128xf32>
    %cst_18 = arith.constant 1.000000e+00 : f32
    %39 = vector.broadcast %cst_18 : f32 to vector<8x128xf32>
    %40 = arith.addf %38, %39 : vector<8x128xf32>
    %cst_19 = arith.constant 5.000000e-01 : f32
    %41 = vector.broadcast %cst_19 : f32 to vector<8x128xf32>
    %42 = arith.mulf %41, %40 : vector<8x128xf32>
    %43 = arith.select %26, %38, %42 : vector<8x128xi1>, vector<8x128xf32>
    %44 = vector.extract_strided_slice %43 {offsets = [0, 0], sizes = [8, 32], strides = [1, 1]} : vector<8x128xf32> to vector<8x32xf32>
    %45 = vector.extract_strided_slice %43 {offsets = [0, 32], sizes = [8, 32], strides = [1, 1]} : vector<8x128xf32> to vector<8x32xf32>
    %46 = vector.extract_strided_slice %43 {offsets = [0, 64], sizes = [8, 32], strides = [1, 1]} : vector<8x128xf32> to vector<8x32xf32>
    %47 = vector.extract_strided_slice %43 {offsets = [0, 96], sizes = [8, 32], strides = [1, 1]} : vector<8x128xf32> to vector<8x32xf32>
    %48 = arith.mulf %45, %27 : vector<8x32xf32>
    %49 = arith.mulf %44, %46 : vector<8x32xf32>
    %50 = arith.addf %48, %49 : vector<8x32xf32>
    %51 = math.tanh %50 : vector<8x32xf32>
    %52 = arith.mulf %47, %51 : vector<8x32xf32>
    %53 = arith.index_cast %c0_i32_13 : i32 to index
    %c0_20 = arith.constant 0 : index
    %c0_21 = arith.constant 0 : index
    %54 = vector.load %arg6[%53, %c0_20, %c0_21] : memref<8x8x32xf32, #tpu.memory_space<vmem>>, vector<1x8x32xf32>
    %55 = vector.shape_cast %54 : vector<1x8x32xf32> to vector<8x32xf32>
    %56 = arith.subf %55, %52 : vector<8x32xf32>
    %57 = arith.index_cast %c0_i32_13 : i32 to index
    %c0_22 = arith.constant 0 : index
    %c0_23 = arith.constant 0 : index
    %58 = vector.load %arg6[%57, %c0_22, %c0_23] : memref<8x8x32xf32, #tpu.memory_space<vmem>>, vector<1x8x32xf32>
    %59 = vector.shape_cast %58 : vector<1x8x32xf32> to vector<8x32xf32>
    %60 = vector.shape_cast %56 : vector<8x32xf32> to vector<1x8x32xf32>
    tpu.vector_store %arg6[%57, %c0_22, %c0_23], %60 {strides = array<i32>} : memref<8x8x32xf32, #tpu.memory_space<vmem>>, vector<1x8x32xf32>,
    %61 = arith.index_cast %c0_i32_13 : i32 to index
    %c0_24 = arith.constant 0 : index
    %c0_25 = arith.constant 0 : index
    %62 = vector.load %arg7[%61, %c0_24, %c0_25] : memref<8x8x32xf32, #tpu.memory_space<vmem>>, vector<1x8x32xf32>
    %63 = vector.shape_cast %62 : vector<1x8x32xf32> to vector<8x32xf32>
    %64 = arith.addf %63, %52 : vector<8x32xf32>
    %65 = arith.index_cast %c0_i32_13 : i32 to index
    %c0_26 = arith.constant 0 : index
    %c0_27 = arith.constant 0 : index
    %66 = vector.load %arg7[%65, %c0_26, %c0_27] : memref<8x8x32xf32, #tpu.memory_space<vmem>>, vector<1x8x32xf32>
    %67 = vector.shape_cast %66 : vector<1x8x32xf32> to vector<8x32xf32>
    %68 = vector.shape_cast %64 : vector<8x32xf32> to vector<1x8x32xf32>
    tpu.vector_store %arg7[%65, %c0_26, %c0_27], %68 {strides = array<i32>} : memref<8x8x32xf32, #tpu.memory_space<vmem>>, vector<1x8x32xf32>,
    %c1_i32 = arith.constant 1 : i32
    %69 = arith.truncf %52 : vector<8x32xf32> to vector<8x32xbf16>
    %cst_28 = arith.constant dense<0.000000e+00> : vector<8x128xf32>
    %70 = tpu.matmul %69, %8, %cst_28 {dimension_numbers = #tpu.dot_dimension_numbers<[1], [0], [0], [1], [0, 0, 1, 1], [], []>} : vector<8x32xbf16>, vector<32x128xbf16>, vector<8x128xf32> -> vector<8x128xf32>
    %71 = arith.index_cast %c1_i32 : i32 to index
    %c0_29 = arith.constant 0 : index
    %c0_30 = arith.constant 0 : index
    %72 = vector.load %arg8[%71, %c0_29, %c0_30] : memref<8x8x128xbf16, #tpu.memory_space<vmem>>, vector<1x8x128xbf16>
    %73 = vector.shape_cast %72 : vector<1x8x128xbf16> to vector<8x128xbf16>
    %74 = arith.extf %73 : vector<8x128xbf16> to vector<8x128xf32>
    %75 = arith.addf %74, %70 : vector<8x128xf32>
    %cst_31 = arith.constant 5.000000e-01 : f32
    %76 = vector.broadcast %cst_31 : f32 to vector<8x128xf32>
    %77 = arith.mulf %76, %75 : vector<8x128xf32>
    %78 = arith.select %26, %75, %77 : vector<8x128xi1>, vector<8x128xf32>
    %79 = math.tanh %78 : vector<8x128xf32>
    %cst_32 = arith.constant 1.000000e+00 : f32
    %80 = vector.broadcast %cst_32 : f32 to vector<8x128xf32>
    %81 = arith.addf %79, %80 : vector<8x128xf32>
    %cst_33 = arith.constant 5.000000e-01 : f32
    %82 = vector.broadcast %cst_33 : f32 to vector<8x128xf32>
    %83 = arith.mulf %82, %81 : vector<8x128xf32>
    %84 = arith.select %26, %79, %83 : vector<8x128xi1>, vector<8x128xf32>
    %85 = vector.extract_strided_slice %84 {offsets = [0, 0], sizes = [8, 32], strides = [1, 1]} : vector<8x128xf32> to vector<8x32xf32>
    %86 = vector.extract_strided_slice %84 {offsets = [0, 32], sizes = [8, 32], strides = [1, 1]} : vector<8x128xf32> to vector<8x32xf32>
    %87 = vector.extract_strided_slice %84 {offsets = [0, 64], sizes = [8, 32], strides = [1, 1]} : vector<8x128xf32> to vector<8x32xf32>
    %88 = vector.extract_strided_slice %84 {offsets = [0, 96], sizes = [8, 32], strides = [1, 1]} : vector<8x128xf32> to vector<8x32xf32>
    %89 = arith.mulf %86, %50 : vector<8x32xf32>
    %90 = arith.mulf %85, %87 : vector<8x32xf32>
    %91 = arith.addf %89, %90 : vector<8x32xf32>
    %92 = math.tanh %91 : vector<8x32xf32>
    %93 = arith.mulf %88, %92 : vector<8x32xf32>
    %94 = arith.index_cast %c1_i32 : i32 to index
    %c0_34 = arith.constant 0 : index
    %c0_35 = arith.constant 0 : index
    %95 = vector.load %arg6[%94, %c0_34, %c0_35] : memref<8x8x32xf32, #tpu.memory_space<vmem>>, vector<1x8x32xf32>
    %96 = vector.shape_cast %95 : vector<1x8x32xf32> to vector<8x32xf32>
    %97 = arith.subf %96, %93 : vector<8x32xf32>
    %98 = arith.index_cast %c1_i32 : i32 to index
    %c0_36 = arith.constant 0 : index
    %c0_37 = arith.constant 0 : index
    %99 = vector.load %arg6[%98, %c0_36, %c0_37] : memref<8x8x32xf32, #tpu.memory_space<vmem>>, vector<1x8x32xf32>
    %100 = vector.shape_cast %99 : vector<1x8x32xf32> to vector<8x32xf32>
    %101 = vector.shape_cast %97 : vector<8x32xf32> to vector<1x8x32xf32>
    tpu.vector_store %arg6[%98, %c0_36, %c0_37], %101 {strides = array<i32>} : memref<8x8x32xf32, #tpu.memory_space<vmem>>, vector<1x8x32xf32>,
    %102 = arith.index_cast %c1_i32 : i32 to index
    %c0_38 = arith.constant 0 : index
    %c0_39 = arith.constant 0 : index
    %103 = vector.load %arg7[%102, %c0_38, %c0_39] : memref<8x8x32xf32, #tpu.memory_space<vmem>>, vector<1x8x32xf32>
    %104 = vector.shape_cast %103 : vector<1x8x32xf32> to vector<8x32xf32>
    %105 = arith.addf %104, %93 : vector<8x32xf32>
    %106 = arith.index_cast %c1_i32 : i32 to index
    %c0_40 = arith.constant 0 : index
    %c0_41 = arith.constant 0 : index
    %107 = vector.load %arg7[%106, %c0_40, %c0_41] : memref<8x8x32xf32, #tpu.memory_space<vmem>>, vector<1x8x32xf32>
    %108 = vector.shape_cast %107 : vector<1x8x32xf32> to vector<8x32xf32>
    %109 = vector.shape_cast %105 : vector<8x32xf32> to vector<1x8x32xf32>
    tpu.vector_store %arg7[%106, %c0_40, %c0_41], %109 {strides = array<i32>} : memref<8x8x32xf32, #tpu.memory_space<vmem>>, vector<1x8x32xf32>,
    %c2_i32 = arith.constant 2 : i32
    %110 = arith.truncf %93 : vector<8x32xf32> to vector<8x32xbf16>
    %cst_42 = arith.constant dense<0.000000e+00> : vector<8x128xf32>
    %111 = tpu.matmul %110, %8, %cst_42 {dimension_numbers = #tpu.dot_dimension_numbers<[1], [0], [0], [1], [0, 0, 1, 1], [], []>} : vector<8x32xbf16>, vector<32x128xbf16>, vector<8x128xf32> -> vector<8x128xf32>
    %112 = arith.index_cast %c2_i32 : i32 to index
    %c0_43 = arith.constant 0 : index
    %c0_44 = arith.constant 0 : index
    %113 = vector.load %arg8[%112, %c0_43, %c0_44] : memref<8x8x128xbf16, #tpu.memory_space<vmem>>, vector<1x8x128xbf16>
    %114 = vector.shape_cast %113 : vector<1x8x128xbf16> to vector<8x128xbf16>
    %115 = arith.extf %114 : vector<8x128xbf16> to vector<8x128xf32>
    %116 = arith.addf %115, %111 : vector<8x128xf32>
    %cst_45 = arith.constant 5.000000e-01 : f32
    %117 = vector.broadcast %cst_45 : f32 to vector<8x128xf32>
    %118 = arith.mulf %117, %116 : vector<8x128xf32>
    %119 = arith.select %26, %116, %118 : vector<8x128xi1>, vector<8x128xf32>
    %120 = math.tanh %119 : vector<8x128xf32>
    %cst_46 = arith.constant 1.000000e+00 : f32
    %121 = vector.broadcast %cst_46 : f32 to vector<8x128xf32>
    %122 = arith.addf %120, %121 : vector<8x128xf32>
    %cst_47 = arith.constant 5.000000e-01 : f32
    %123 = vector.broadcast %cst_47 : f32 to vector<8x128xf32>
    %124 = arith.mulf %123, %122 : vector<8x128xf32>
    %125 = arith.select %26, %120, %124 : vector<8x128xi1>, vector<8x128xf32>
    %126 = vector.extract_strided_slice %125 {offsets = [0, 0], sizes = [8, 32], strides = [1, 1]} : vector<8x128xf32> to vector<8x32xf32>
    %127 = vector.extract_strided_slice %125 {offsets = [0, 32], sizes = [8, 32], strides = [1, 1]} : vector<8x128xf32> to vector<8x32xf32>
    %128 = vector.extract_strided_slice %125 {offsets = [0, 64], sizes = [8, 32], strides = [1, 1]} : vector<8x128xf32> to vector<8x32xf32>
    %129 = vector.extract_strided_slice %125 {offsets = [0, 96], sizes = [8, 32], strides = [1, 1]} : vector<8x128xf32> to vector<8x32xf32>
    %130 = arith.mulf %127, %91 : vector<8x32xf32>
    %131 = arith.mulf %126, %128 : vector<8x32xf32>
    %132 = arith.addf %130, %131 : vector<8x32xf32>
    %133 = math.tanh %132 : vector<8x32xf32>
    %134 = arith.mulf %129, %133 : vector<8x32xf32>
    %135 = arith.index_cast %c2_i32 : i32 to index
    %c0_48 = arith.constant 0 : index
    %c0_49 = arith.constant 0 : index
    %136 = vector.load %arg6[%135, %c0_48, %c0_49] : memref<8x8x32xf32, #tpu.memory_space<vmem>>, vector<1x8x32xf32>
    %137 = vector.shape_cast %136 : vector<1x8x32xf32> to vector<8x32xf32>
    %138 = arith.subf %137, %134 : vector<8x32xf32>
    %139 = arith.index_cast %c2_i32 : i32 to index
    %c0_50 = arith.constant 0 : index
    %c0_51 = arith.constant 0 : index
    %140 = vector.load %arg6[%139, %c0_50, %c0_51] : memref<8x8x32xf32, #tpu.memory_space<vmem>>, vector<1x8x32xf32>
    %141 = vector.shape_cast %140 : vector<1x8x32xf32> to vector<8x32xf32>
    %142 = vector.shape_cast %138 : vector<8x32xf32> to vector<1x8x32xf32>
    tpu.vector_store %arg6[%139, %c0_50, %c0_51], %142 {strides = array<i32>} : memref<8x8x32xf32, #tpu.memory_space<vmem>>, vector<1x8x32xf32>,
    %143 = arith.index_cast %c2_i32 : i32 to index
    %c0_52 = arith.constant 0 : index
    %c0_53 = arith.constant 0 : index
    %144 = vector.load %arg7[%143, %c0_52, %c0_53] : memref<8x8x32xf32, #tpu.memory_space<vmem>>, vector<1x8x32xf32>
    %145 = vector.shape_cast %144 : vector<1x8x32xf32> to vector<8x32xf32>
    %146 = arith.addf %145, %134 : vector<8x32xf32>
    %147 = arith.index_cast %c2_i32 : i32 to index
    %c0_54 = arith.constant 0 : index
    %c0_55 = arith.constant 0 : index
    %148 = vector.load %arg7[%147, %c0_54, %c0_55] : memref<8x8x32xf32, #tpu.memory_space<vmem>>, vector<1x8x32xf32>
    %149 = vector.shape_cast %148 : vector<1x8x32xf32> to vector<8x32xf32>
    %150 = vector.shape_cast %146 : vector<8x32xf32> to vector<1x8x32xf32>
    tpu.vector_store %arg7[%147, %c0_54, %c0_55], %150 {strides = array<i32>} : memref<8x8x32xf32, #tpu.memory_space<vmem>>, vector<1x8x32xf32>,
    %c3_i32 = arith.constant 3 : i32
    %151 = arith.truncf %134 : vector<8x32xf32> to vector<8x32xbf16>
    %cst_56 = arith.constant dense<0.000000e+00> : vector<8x128xf32>
    %152 = tpu.matmul %151, %8, %cst_56 {dimension_numbers = #tpu.dot_dimension_numbers<[1], [0], [0], [1], [0, 0, 1, 1], [], []>} : vector<8x32xbf16>, vector<32x128xbf16>, vector<8x128xf32> -> vector<8x128xf32>
    %153 = arith.index_cast %c3_i32 : i32 to index
    %c0_57 = arith.constant 0 : index
    %c0_58 = arith.constant 0 : index
    %154 = vector.load %arg8[%153, %c0_57, %c0_58] : memref<8x8x128xbf16, #tpu.memory_space<vmem>>, vector<1x8x128xbf16>
    %155 = vector.shape_cast %154 : vector<1x8x128xbf16> to vector<8x128xbf16>
    %156 = arith.extf %155 : vector<8x128xbf16> to vector<8x128xf32>
    %157 = arith.addf %156, %152 : vector<8x128xf32>
    %cst_59 = arith.constant 5.000000e-01 : f32
    %158 = vector.broadcast %cst_59 : f32 to vector<8x128xf32>
    %159 = arith.mulf %158, %157 : vector<8x128xf32>
    %160 = arith.select %26, %157, %159 : vector<8x128xi1>, vector<8x128xf32>
    %161 = math.tanh %160 : vector<8x128xf32>
    %cst_60 = arith.constant 1.000000e+00 : f32
    %162 = vector.broadcast %cst_60 : f32 to vector<8x128xf32>
    %163 = arith.addf %161, %162 : vector<8x128xf32>
    %cst_61 = arith.constant 5.000000e-01 : f32
    %164 = vector.broadcast %cst_61 : f32 to vector<8x128xf32>
    %165 = arith.mulf %164, %163 : vector<8x128xf32>
    %166 = arith.select %26, %161, %165 : vector<8x128xi1>, vector<8x128xf32>
    %167 = vector.extract_strided_slice %166 {offsets = [0, 0], sizes = [8, 32], strides = [1, 1]} : vector<8x128xf32> to vector<8x32xf32>
    %168 = vector.extract_strided_slice %166 {offsets = [0, 32], sizes = [8, 32], strides = [1, 1]} : vector<8x128xf32> to vector<8x32xf32>
    %169 = vector.extract_strided_slice %166 {offsets = [0, 64], sizes = [8, 32], strides = [1, 1]} : vector<8x128xf32> to vector<8x32xf32>
    %170 = vector.extract_strided_slice %166 {offsets = [0, 96], sizes = [8, 32], strides = [1, 1]} : vector<8x128xf32> to vector<8x32xf32>
    %171 = arith.mulf %168, %132 : vector<8x32xf32>
    %172 = arith.mulf %167, %169 : vector<8x32xf32>
    %173 = arith.addf %171, %172 : vector<8x32xf32>
    %174 = math.tanh %173 : vector<8x32xf32>
    %175 = arith.mulf %170, %174 : vector<8x32xf32>
    %176 = arith.index_cast %c3_i32 : i32 to index
    %c0_62 = arith.constant 0 : index
    %c0_63 = arith.constant 0 : index
    %177 = vector.load %arg6[%176, %c0_62, %c0_63] : memref<8x8x32xf32, #tpu.memory_space<vmem>>, vector<1x8x32xf32>
    %178 = vector.shape_cast %177 : vector<1x8x32xf32> to vector<8x32xf32>
    %179 = arith.subf %178, %175 : vector<8x32xf32>
    %180 = arith.index_cast %c3_i32 : i32 to index
    %c0_64 = arith.constant 0 : index
    %c0_65 = arith.constant 0 : index
    %181 = vector.load %arg6[%180, %c0_64, %c0_65] : memref<8x8x32xf32, #tpu.memory_space<vmem>>, vector<1x8x32xf32>
    %182 = vector.shape_cast %181 : vector<1x8x32xf32> to vector<8x32xf32>
    %183 = vector.shape_cast %179 : vector<8x32xf32> to vector<1x8x32xf32>
    tpu.vector_store %arg6[%180, %c0_64, %c0_65], %183 {strides = array<i32>} : memref<8x8x32xf32, #tpu.memory_space<vmem>>, vector<1x8x32xf32>,
    %184 = arith.index_cast %c3_i32 : i32 to index
    %c0_66 = arith.constant 0 : index
    %c0_67 = arith.constant 0 : index
    %185 = vector.load %arg7[%184, %c0_66, %c0_67] : memref<8x8x32xf32, #tpu.memory_space<vmem>>, vector<1x8x32xf32>
    %186 = vector.shape_cast %185 : vector<1x8x32xf32> to vector<8x32xf32>
    %187 = arith.addf %186, %175 : vector<8x32xf32>
    %188 = arith.index_cast %c3_i32 : i32 to index
    %c0_68 = arith.constant 0 : index
    %c0_69 = arith.constant 0 : index
    %189 = vector.load %arg7[%188, %c0_68, %c0_69] : memref<8x8x32xf32, #tpu.memory_space<vmem>>, vector<1x8x32xf32>
    %190 = vector.shape_cast %189 : vector<1x8x32xf32> to vector<8x32xf32>
    %191 = vector.shape_cast %187 : vector<8x32xf32> to vector<1x8x32xf32>
    tpu.vector_store %arg7[%188, %c0_68, %c0_69], %191 {strides = array<i32>} : memref<8x8x32xf32, #tpu.memory_space<vmem>>, vector<1x8x32xf32>,
    %c4_i32 = arith.constant 4 : i32
    %192 = arith.truncf %175 : vector<8x32xf32> to vector<8x32xbf16>
    %cst_70 = arith.constant dense<0.000000e+00> : vector<8x128xf32>
    %193 = tpu.matmul %192, %8, %cst_70 {dimension_numbers = #tpu.dot_dimension_numbers<[1], [0], [0], [1], [0, 0, 1, 1], [], []>} : vector<8x32xbf16>, vector<32x128xbf16>, vector<8x128xf32> -> vector<8x128xf32>
    %194 = arith.index_cast %c4_i32 : i32 to index
    %c0_71 = arith.constant 0 : index
    %c0_72 = arith.constant 0 : index
    %195 = vector.load %arg8[%194, %c0_71, %c0_72] : memref<8x8x128xbf16, #tpu.memory_space<vmem>>, vector<1x8x128xbf16>
    %196 = vector.shape_cast %195 : vector<1x8x128xbf16> to vector<8x128xbf16>
    %197 = arith.extf %196 : vector<8x128xbf16> to vector<8x128xf32>
    %198 = arith.addf %197, %193 : vector<8x128xf32>
    %cst_73 = arith.constant 5.000000e-01 : f32
    %199 = vector.broadcast %cst_73 : f32 to vector<8x128xf32>
    %200 = arith.mulf %199, %198 : vector<8x128xf32>
    %201 = arith.select %26, %198, %200 : vector<8x128xi1>, vector<8x128xf32>
    %202 = math.tanh %201 : vector<8x128xf32>
    %cst_74 = arith.constant 1.000000e+00 : f32
    %203 = vector.broadcast %cst_74 : f32 to vector<8x128xf32>
    %204 = arith.addf %202, %203 : vector<8x128xf32>
    %cst_75 = arith.constant 5.000000e-01 : f32
    %205 = vector.broadcast %cst_75 : f32 to vector<8x128xf32>
    %206 = arith.mulf %205, %204 : vector<8x128xf32>
    %207 = arith.select %26, %202, %206 : vector<8x128xi1>, vector<8x128xf32>
    %208 = vector.extract_strided_slice %207 {offsets = [0, 0], sizes = [8, 32], strides = [1, 1]} : vector<8x128xf32> to vector<8x32xf32>
    %209 = vector.extract_strided_slice %207 {offsets = [0, 32], sizes = [8, 32], strides = [1, 1]} : vector<8x128xf32> to vector<8x32xf32>
    %210 = vector.extract_strided_slice %207 {offsets = [0, 64], sizes = [8, 32], strides = [1, 1]} : vector<8x128xf32> to vector<8x32xf32>
    %211 = vector.extract_strided_slice %207 {offsets = [0, 96], sizes = [8, 32], strides = [1, 1]} : vector<8x128xf32> to vector<8x32xf32>
    %212 = arith.mulf %209, %173 : vector<8x32xf32>
    %213 = arith.mulf %208, %210 : vector<8x32xf32>
    %214 = arith.addf %212, %213 : vector<8x32xf32>
    %215 = math.tanh %214 : vector<8x32xf32>
    %216 = arith.mulf %211, %215 : vector<8x32xf32>
    %217 = arith.index_cast %c4_i32 : i32 to index
    %c0_76 = arith.constant 0 : index
    %c0_77 = arith.constant 0 : index
    %218 = vector.load %arg6[%217, %c0_76, %c0_77] : memref<8x8x32xf32, #tpu.memory_space<vmem>>, vector<1x8x32xf32>
    %219 = vector.shape_cast %218 : vector<1x8x32xf32> to vector<8x32xf32>
    %220 = arith.subf %219, %216 : vector<8x32xf32>
    %221 = arith.index_cast %c4_i32 : i32 to index
    %c0_78 = arith.constant 0 : index
    %c0_79 = arith.constant 0 : index
    %222 = vector.load %arg6[%221, %c0_78, %c0_79] : memref<8x8x32xf32, #tpu.memory_space<vmem>>, vector<1x8x32xf32>
    %223 = vector.shape_cast %222 : vector<1x8x32xf32> to vector<8x32xf32>
    %224 = vector.shape_cast %220 : vector<8x32xf32> to vector<1x8x32xf32>
    tpu.vector_store %arg6[%221, %c0_78, %c0_79], %224 {strides = array<i32>} : memref<8x8x32xf32, #tpu.memory_space<vmem>>, vector<1x8x32xf32>,
    %225 = arith.index_cast %c4_i32 : i32 to index
    %c0_80 = arith.constant 0 : index
    %c0_81 = arith.constant 0 : index
    %226 = vector.load %arg7[%225, %c0_80, %c0_81] : memref<8x8x32xf32, #tpu.memory_space<vmem>>, vector<1x8x32xf32>
    %227 = vector.shape_cast %226 : vector<1x8x32xf32> to vector<8x32xf32>
    %228 = arith.addf %227, %216 : vector<8x32xf32>
    %229 = arith.index_cast %c4_i32 : i32 to index
    %c0_82 = arith.constant 0 : index
    %c0_83 = arith.constant 0 : index
    %230 = vector.load %arg7[%229, %c0_82, %c0_83] : memref<8x8x32xf32, #tpu.memory_space<vmem>>, vector<1x8x32xf32>
    %231 = vector.shape_cast %230 : vector<1x8x32xf32> to vector<8x32xf32>
    %232 = vector.shape_cast %228 : vector<8x32xf32> to vector<1x8x32xf32>
    tpu.vector_store %arg7[%229, %c0_82, %c0_83], %232 {strides = array<i32>} : memref<8x8x32xf32, #tpu.memory_space<vmem>>, vector<1x8x32xf32>,
    %c5_i32 = arith.constant 5 : i32
    %233 = arith.truncf %216 : vector<8x32xf32> to vector<8x32xbf16>
    %cst_84 = arith.constant dense<0.000000e+00> : vector<8x128xf32>
    %234 = tpu.matmul %233, %8, %cst_84 {dimension_numbers = #tpu.dot_dimension_numbers<[1], [0], [0], [1], [0, 0, 1, 1], [], []>} : vector<8x32xbf16>, vector<32x128xbf16>, vector<8x128xf32> -> vector<8x128xf32>
    %235 = arith.index_cast %c5_i32 : i32 to index
    %c0_85 = arith.constant 0 : index
    %c0_86 = arith.constant 0 : index
    %236 = vector.load %arg8[%235, %c0_85, %c0_86] : memref<8x8x128xbf16, #tpu.memory_space<vmem>>, vector<1x8x128xbf16>
    %237 = vector.shape_cast %236 : vector<1x8x128xbf16> to vector<8x128xbf16>
    %238 = arith.extf %237 : vector<8x128xbf16> to vector<8x128xf32>
    %239 = arith.addf %238, %234 : vector<8x128xf32>
    %cst_87 = arith.constant 5.000000e-01 : f32
    %240 = vector.broadcast %cst_87 : f32 to vector<8x128xf32>
    %241 = arith.mulf %240, %239 : vector<8x128xf32>
    %242 = arith.select %26, %239, %241 : vector<8x128xi1>, vector<8x128xf32>
    %243 = math.tanh %242 : vector<8x128xf32>
    %cst_88 = arith.constant 1.000000e+00 : f32
    %244 = vector.broadcast %cst_88 : f32 to vector<8x128xf32>
    %245 = arith.addf %243, %244 : vector<8x128xf32>
    %cst_89 = arith.constant 5.000000e-01 : f32
    %246 = vector.broadcast %cst_89 : f32 to vector<8x128xf32>
    %247 = arith.mulf %246, %245 : vector<8x128xf32>
    %248 = arith.select %26, %243, %247 : vector<8x128xi1>, vector<8x128xf32>
    %249 = vector.extract_strided_slice %248 {offsets = [0, 0], sizes = [8, 32], strides = [1, 1]} : vector<8x128xf32> to vector<8x32xf32>
    %250 = vector.extract_strided_slice %248 {offsets = [0, 32], sizes = [8, 32], strides = [1, 1]} : vector<8x128xf32> to vector<8x32xf32>
    %251 = vector.extract_strided_slice %248 {offsets = [0, 64], sizes = [8, 32], strides = [1, 1]} : vector<8x128xf32> to vector<8x32xf32>
    %252 = vector.extract_strided_slice %248 {offsets = [0, 96], sizes = [8, 32], strides = [1, 1]} : vector<8x128xf32> to vector<8x32xf32>
    %253 = arith.mulf %250, %214 : vector<8x32xf32>
    %254 = arith.mulf %249, %251 : vector<8x32xf32>
    %255 = arith.addf %253, %254 : vector<8x32xf32>
    %256 = math.tanh %255 : vector<8x32xf32>
    %257 = arith.mulf %252, %256 : vector<8x32xf32>
    %258 = arith.index_cast %c5_i32 : i32 to index
    %c0_90 = arith.constant 0 : index
    %c0_91 = arith.constant 0 : index
    %259 = vector.load %arg6[%258, %c0_90, %c0_91] : memref<8x8x32xf32, #tpu.memory_space<vmem>>, vector<1x8x32xf32>
    %260 = vector.shape_cast %259 : vector<1x8x32xf32> to vector<8x32xf32>
    %261 = arith.subf %260, %257 : vector<8x32xf32>
    %262 = arith.index_cast %c5_i32 : i32 to index
    %c0_92 = arith.constant 0 : index
    %c0_93 = arith.constant 0 : index
    %263 = vector.load %arg6[%262, %c0_92, %c0_93] : memref<8x8x32xf32, #tpu.memory_space<vmem>>, vector<1x8x32xf32>
    %264 = vector.shape_cast %263 : vector<1x8x32xf32> to vector<8x32xf32>
    %265 = vector.shape_cast %261 : vector<8x32xf32> to vector<1x8x32xf32>
    tpu.vector_store %arg6[%262, %c0_92, %c0_93], %265 {strides = array<i32>} : memref<8x8x32xf32, #tpu.memory_space<vmem>>, vector<1x8x32xf32>,
    %266 = arith.index_cast %c5_i32 : i32 to index
    %c0_94 = arith.constant 0 : index
    %c0_95 = arith.constant 0 : index
    %267 = vector.load %arg7[%266, %c0_94, %c0_95] : memref<8x8x32xf32, #tpu.memory_space<vmem>>, vector<1x8x32xf32>
    %268 = vector.shape_cast %267 : vector<1x8x32xf32> to vector<8x32xf32>
    %269 = arith.addf %268, %257 : vector<8x32xf32>
    %270 = arith.index_cast %c5_i32 : i32 to index
    %c0_96 = arith.constant 0 : index
    %c0_97 = arith.constant 0 : index
    %271 = vector.load %arg7[%270, %c0_96, %c0_97] : memref<8x8x32xf32, #tpu.memory_space<vmem>>, vector<1x8x32xf32>
    %272 = vector.shape_cast %271 : vector<1x8x32xf32> to vector<8x32xf32>
    %273 = vector.shape_cast %269 : vector<8x32xf32> to vector<1x8x32xf32>
    tpu.vector_store %arg7[%270, %c0_96, %c0_97], %273 {strides = array<i32>} : memref<8x8x32xf32, #tpu.memory_space<vmem>>, vector<1x8x32xf32>,
    %c6_i32 = arith.constant 6 : i32
    %274 = arith.truncf %257 : vector<8x32xf32> to vector<8x32xbf16>
    %cst_98 = arith.constant dense<0.000000e+00> : vector<8x128xf32>
    %275 = tpu.matmul %274, %8, %cst_98 {dimension_numbers = #tpu.dot_dimension_numbers<[1], [0], [0], [1], [0, 0, 1, 1], [], []>} : vector<8x32xbf16>, vector<32x128xbf16>, vector<8x128xf32> -> vector<8x128xf32>
    %276 = arith.index_cast %c6_i32 : i32 to index
    %c0_99 = arith.constant 0 : index
    %c0_100 = arith.constant 0 : index
    %277 = vector.load %arg8[%276, %c0_99, %c0_100] : memref<8x8x128xbf16, #tpu.memory_space<vmem>>, vector<1x8x128xbf16>
    %278 = vector.shape_cast %277 : vector<1x8x128xbf16> to vector<8x128xbf16>
    %279 = arith.extf %278 : vector<8x128xbf16> to vector<8x128xf32>
    %280 = arith.addf %279, %275 : vector<8x128xf32>
    %cst_101 = arith.constant 5.000000e-01 : f32
    %281 = vector.broadcast %cst_101 : f32 to vector<8x128xf32>
    %282 = arith.mulf %281, %280 : vector<8x128xf32>
    %283 = arith.select %26, %280, %282 : vector<8x128xi1>, vector<8x128xf32>
    %284 = math.tanh %283 : vector<8x128xf32>
    %cst_102 = arith.constant 1.000000e+00 : f32
    %285 = vector.broadcast %cst_102 : f32 to vector<8x128xf32>
    %286 = arith.addf %284, %285 : vector<8x128xf32>
    %cst_103 = arith.constant 5.000000e-01 : f32
    %287 = vector.broadcast %cst_103 : f32 to vector<8x128xf32>
    %288 = arith.mulf %287, %286 : vector<8x128xf32>
    %289 = arith.select %26, %284, %288 : vector<8x128xi1>, vector<8x128xf32>
    %290 = vector.extract_strided_slice %289 {offsets = [0, 0], sizes = [8, 32], strides = [1, 1]} : vector<8x128xf32> to vector<8x32xf32>
    %291 = vector.extract_strided_slice %289 {offsets = [0, 32], sizes = [8, 32], strides = [1, 1]} : vector<8x128xf32> to vector<8x32xf32>
    %292 = vector.extract_strided_slice %289 {offsets = [0, 64], sizes = [8, 32], strides = [1, 1]} : vector<8x128xf32> to vector<8x32xf32>
    %293 = vector.extract_strided_slice %289 {offsets = [0, 96], sizes = [8, 32], strides = [1, 1]} : vector<8x128xf32> to vector<8x32xf32>
    %294 = arith.mulf %291, %255 : vector<8x32xf32>
    %295 = arith.mulf %290, %292 : vector<8x32xf32>
    %296 = arith.addf %294, %295 : vector<8x32xf32>
    %297 = math.tanh %296 : vector<8x32xf32>
    %298 = arith.mulf %293, %297 : vector<8x32xf32>
    %299 = arith.index_cast %c6_i32 : i32 to index
    %c0_104 = arith.constant 0 : index
    %c0_105 = arith.constant 0 : index
    %300 = vector.load %arg6[%299, %c0_104, %c0_105] : memref<8x8x32xf32, #tpu.memory_space<vmem>>, vector<1x8x32xf32>
    %301 = vector.shape_cast %300 : vector<1x8x32xf32> to vector<8x32xf32>
    %302 = arith.subf %301, %298 : vector<8x32xf32>
    %303 = arith.index_cast %c6_i32 : i32 to index
    %c0_106 = arith.constant 0 : index
    %c0_107 = arith.constant 0 : index
    %304 = vector.load %arg6[%303, %c0_106, %c0_107] : memref<8x8x32xf32, #tpu.memory_space<vmem>>, vector<1x8x32xf32>
    %305 = vector.shape_cast %304 : vector<1x8x32xf32> to vector<8x32xf32>
    %306 = vector.shape_cast %302 : vector<8x32xf32> to vector<1x8x32xf32>
    tpu.vector_store %arg6[%303, %c0_106, %c0_107], %306 {strides = array<i32>} : memref<8x8x32xf32, #tpu.memory_space<vmem>>, vector<1x8x32xf32>,
    %307 = arith.index_cast %c6_i32 : i32 to index
    %c0_108 = arith.constant 0 : index
    %c0_109 = arith.constant 0 : index
    %308 = vector.load %arg7[%307, %c0_108, %c0_109] : memref<8x8x32xf32, #tpu.memory_space<vmem>>, vector<1x8x32xf32>
    %309 = vector.shape_cast %308 : vector<1x8x32xf32> to vector<8x32xf32>
    %310 = arith.addf %309, %298 : vector<8x32xf32>
    %311 = arith.index_cast %c6_i32 : i32 to index
    %c0_110 = arith.constant 0 : index
    %c0_111 = arith.constant 0 : index
    %312 = vector.load %arg7[%311, %c0_110, %c0_111] : memref<8x8x32xf32, #tpu.memory_space<vmem>>, vector<1x8x32xf32>
    %313 = vector.shape_cast %312 : vector<1x8x32xf32> to vector<8x32xf32>
    %314 = vector.shape_cast %310 : vector<8x32xf32> to vector<1x8x32xf32>
    tpu.vector_store %arg7[%311, %c0_110, %c0_111], %314 {strides = array<i32>} : memref<8x8x32xf32, #tpu.memory_space<vmem>>, vector<1x8x32xf32>,
    %c7_i32 = arith.constant 7 : i32
    %315 = arith.truncf %298 : vector<8x32xf32> to vector<8x32xbf16>
    %cst_112 = arith.constant dense<0.000000e+00> : vector<8x128xf32>
    %316 = tpu.matmul %315, %8, %cst_112 {dimension_numbers = #tpu.dot_dimension_numbers<[1], [0], [0], [1], [0, 0, 1, 1], [], []>} : vector<8x32xbf16>, vector<32x128xbf16>, vector<8x128xf32> -> vector<8x128xf32>
    %317 = arith.index_cast %c7_i32 : i32 to index
    %c0_113 = arith.constant 0 : index
    %c0_114 = arith.constant 0 : index
    %318 = vector.load %arg8[%317, %c0_113, %c0_114] : memref<8x8x128xbf16, #tpu.memory_space<vmem>>, vector<1x8x128xbf16>
    %319 = vector.shape_cast %318 : vector<1x8x128xbf16> to vector<8x128xbf16>
    %320 = arith.extf %319 : vector<8x128xbf16> to vector<8x128xf32>
    %321 = arith.addf %320, %316 : vector<8x128xf32>
    %cst_115 = arith.constant 5.000000e-01 : f32
    %322 = vector.broadcast %cst_115 : f32 to vector<8x128xf32>
    %323 = arith.mulf %322, %321 : vector<8x128xf32>
    %324 = arith.select %26, %321, %323 : vector<8x128xi1>, vector<8x128xf32>
    %325 = math.tanh %324 : vector<8x128xf32>
    %cst_116 = arith.constant 1.000000e+00 : f32
    %326 = vector.broadcast %cst_116 : f32 to vector<8x128xf32>
    %327 = arith.addf %325, %326 : vector<8x128xf32>
    %cst_117 = arith.constant 5.000000e-01 : f32
    %328 = vector.broadcast %cst_117 : f32 to vector<8x128xf32>
    %329 = arith.mulf %328, %327 : vector<8x128xf32>
    %330 = arith.select %26, %325, %329 : vector<8x128xi1>, vector<8x128xf32>
    %331 = vector.extract_strided_slice %330 {offsets = [0, 0], sizes = [8, 32], strides = [1, 1]} : vector<8x128xf32> to vector<8x32xf32>
    %332 = vector.extract_strided_slice %330 {offsets = [0, 32], sizes = [8, 32], strides = [1, 1]} : vector<8x128xf32> to vector<8x32xf32>
    %333 = vector.extract_strided_slice %330 {offsets = [0, 64], sizes = [8, 32], strides = [1, 1]} : vector<8x128xf32> to vector<8x32xf32>
    %334 = vector.extract_strided_slice %330 {offsets = [0, 96], sizes = [8, 32], strides = [1, 1]} : vector<8x128xf32> to vector<8x32xf32>
    %335 = arith.mulf %332, %296 : vector<8x32xf32>
    %336 = arith.mulf %331, %333 : vector<8x32xf32>
    %337 = arith.addf %335, %336 : vector<8x32xf32>
    %338 = math.tanh %337 : vector<8x32xf32>
    %339 = arith.mulf %334, %338 : vector<8x32xf32>
    %340 = arith.index_cast %c7_i32 : i32 to index
    %c0_118 = arith.constant 0 : index
    %c0_119 = arith.constant 0 : index
    %341 = vector.load %arg6[%340, %c0_118, %c0_119] : memref<8x8x32xf32, #tpu.memory_space<vmem>>, vector<1x8x32xf32>
    %342 = vector.shape_cast %341 : vector<1x8x32xf32> to vector<8x32xf32>
    %343 = arith.subf %342, %339 : vector<8x32xf32>
    %344 = arith.index_cast %c7_i32 : i32 to index
    %c0_120 = arith.constant 0 : index
    %c0_121 = arith.constant 0 : index
    %345 = vector.load %arg6[%344, %c0_120, %c0_121] : memref<8x8x32xf32, #tpu.memory_space<vmem>>, vector<1x8x32xf32>
    %346 = vector.shape_cast %345 : vector<1x8x32xf32> to vector<8x32xf32>
    %347 = vector.shape_cast %343 : vector<8x32xf32> to vector<1x8x32xf32>
    tpu.vector_store %arg6[%344, %c0_120, %c0_121], %347 {strides = array<i32>} : memref<8x8x32xf32, #tpu.memory_space<vmem>>, vector<1x8x32xf32>,
    %348 = arith.index_cast %c7_i32 : i32 to index
    %c0_122 = arith.constant 0 : index
    %c0_123 = arith.constant 0 : index
    %349 = vector.load %arg7[%348, %c0_122, %c0_123] : memref<8x8x32xf32, #tpu.memory_space<vmem>>, vector<1x8x32xf32>
    %350 = vector.shape_cast %349 : vector<1x8x32xf32> to vector<8x32xf32>
    %351 = arith.addf %350, %339 : vector<8x32xf32>
    %352 = arith.index_cast %c7_i32 : i32 to index
    %c0_124 = arith.constant 0 : index
    %c0_125 = arith.constant 0 : index
    %353 = vector.load %arg7[%352, %c0_124, %c0_125] : memref<8x8x32xf32, #tpu.memory_space<vmem>>, vector<1x8x32xf32>
    %354 = vector.shape_cast %353 : vector<1x8x32xf32> to vector<8x32xf32>
    %355 = vector.shape_cast %351 : vector<8x32xf32> to vector<1x8x32xf32>
    tpu.vector_store %arg7[%352, %c0_124, %c0_125], %355 {strides = array<i32>} : memref<8x8x32xf32, #tpu.memory_space<vmem>>, vector<1x8x32xf32>,
    %c8_i32 = arith.constant 8 : i32
    return
  }
  func.func @transform_0(%arg0: i32, %arg1: i32) -> (i32, i32, i32) {
    %c0_i32 = arith.constant 0 : i32
    %c0_i32_0 = arith.constant 0 : i32
    %c0_i32_1 = arith.constant 0 : i32
    return %c0_i32, %arg0, %c0_i32_0 : i32, i32, i32
  }
  func.func @transform_1(%arg0: i32, %arg1: i32) -> (i32, i32, i32) {
    %c0_i32 = arith.constant 0 : i32
    %c0_i32_0 = arith.constant 0 : i32
    %c0_i32_1 = arith.constant 0 : i32
    %c0_i32_2 = arith.constant 0 : i32
    return %c0_i32, %c0_i32_0, %c0_i32_1 : i32, i32, i32
  }
  func.func @transform_2(%arg0: i32, %arg1: i32) -> (i32, i32, i32) {
    %c0_i32 = arith.constant 0 : i32
    %c0_i32_0 = arith.constant 0 : i32
    %c0_i32_1 = arith.constant 0 : i32
    %c0_i32_2 = arith.constant 0 : i32
    return %c0_i32, %c0_i32_0, %c0_i32_1 : i32, i32, i32
  }
  func.func @transform_3(%arg0: i32, %arg1: i32) -> (i32, i32, i32) {
    %c0_i32 = arith.constant 0 : i32
    %c0_i32_0 = arith.constant 0 : i32
    %c0_i32_1 = arith.constant 0 : i32
    %c0_i32_2 = arith.constant 0 : i32
    return %c0_i32, %c0_i32_0, %c0_i32_1 : i32, i32, i32
  }
  func.func @transform_4(%arg0: i32, %arg1: i32) -> (i32, i32, i32) {
    %c0_i32 = arith.constant 0 : i32
    %c0_i32_0 = arith.constant 0 : i32
    %c0_i32_1 = arith.constant 0 : i32
    return %c0_i32, %arg0, %c0_i32_0 : i32, i32, i32
  }
  func.func @transform_5(%arg0: i32, %arg1: i32) -> (i32, i32, i32) {
    %c0_i32 = arith.constant 0 : i32
    %c0_i32_0 = arith.constant 0 : i32
    %c0_i32_1 = arith.constant 0 : i32
    return %c0_i32, %arg0, %c0_i32_0 : i32, i32, i32
  }
}

</mosaic_0001>

<bundles_post_ra>
// kernel: stack_forward.1
= control target key start
LH: loop header
LB: loop body
LE: loop exit
PB: predicated region body
PF: predicated region fallthrough
CT: control target
= control target key end

     0   :  { %11 = vsyncpa [#allocation4], 0  ;;  %s1595_s18 = smov 0   ;;  %s1597_s19 = smov 0   ;;  %s2082_s0 = inlined_call_operand.vmem [shape: f32[8,8,32], index: 0, kind: input, shape index: {}]   ;;  %s2083_s1 = inlined_call_operand.vmem [shape: bf16[4,32,128], index: 1, kind: input, shape index: {}]   ;;  %s2084_s2 = inlined_call_operand.hbm [shape: bf16[4,32,128], index: 2, kind: input, shape index: {}]   ;;  %s2085_s3 = inlined_call_operand.vmem [shape: f32[4,1,128], index: 3, kind: input, shape index: {}]   ;;  %s2086_s4 = inlined_call_operand.vmem [shape: f32[8,8,32], index: 4, kind: output, shape index: {0}]   ;;  %s2087_s5 = inlined_call_operand.vmem [shape: f32[8,8,32], index: 5, kind: output, shape index: {1}]  }
   0x1   :  { %s1599_s20 = smov 0  }
   0x2 LB: > { %s1232_s21 = sadd.s32 4294967295, %s1554_s20   ;;  %s26_s22 = sadd.s32 1, %s1550_s19  ;;  %s1554_s20 = sphi %s1599_s20, %s17_s20   ;;  %s1550_s19 = sphi %s1597_s19, %s2099_s19   ;;  %s1546_s18 = sphi %s1595_s18, %s2098_s18  }
   0x3   : > { %p27_p0 = scmp.ge.s32.totalorder %s26_s22, 4  ;;  %p1233_p1 = scmp.ge.s32.totalorder %s1554_s20, 1 }
   0x4   : > { %p175_p2 = scmp.lt.s32.totalorder %s1554_s20, 5  ;;  %p1620_p4 = scmp.eq.s32.totalorder %s1232_s21, 0 }
   0x5   : > { %s2101_s22 = smov (%p27_p0, %s26_s22), 0  ;;  %s1556_s25 = smov [#allocation3]  }
   0x6   : > { %p1616_p3 = pnand %p1233_p1, %p175_p2  ;;  %s197_s26 = sshll.u32 %s1556_s25, 4  ;;  %s198_s26 = int_to_ptr.vmem [resolvable:$true] %s197_s26 }
   0x7   : > { %s2092_s24 = scalar_select %p1620_p4, 1, 0 }
   0x8   : > { %s2091_s23 = scalar_select %p1616_p3, 1, 0 }
   0x9   : > { %p1425_p5 = pneg %p1616_p3  ;;  %s1500_s30 = scalar_lea.hbm %s2084_s2, 1024 }
   0xa   : > { %p1501_p7 = scmp.ne.s32.totalorder %s2084_s2, %s1500_s30  ;;  %p1507_p11 = scmp.lt.u32.totalorder %s1500_s30, %s2084_s2 }
   0xb   : > { %p1628_p6 = pnand %p1620_p4, %p1425_p5 }
   0xd   : > { %p1502_p8 = pneg %p1628_p6 }
   0xf   : > { %p1503_p9 = pnand %p1502_p8, %p1501_p7 }
  0x11   : > { %p1504_p10 = pneg %p1503_p9 }
  0x13   : > { %p1509_p12 = pnand %p1507_p11, %p1504_p10 }
  0x15   : > { %1512 = shalt.err (!%p1509_p12)
}
  0x16   : > { %s1513_s10 = scalar_lea.vmem %s198_s26, 1024  ;;  %p1521_p2 = scmp.lt.s32.totalorder %s198_s26, %s198_s26 }
  0x17   : > { %p1514_p13 = scmp.ne.s32.totalorder %s198_s26, %s1513_s10  ;;  %p1522_p5 = scmp.lt.s32.totalorder %s1513_s10, %s1513_s10 }
  0x19   : > { %p1516_p0 = pnand %p1514_p13, %p1502_p8  ;;  %p1523_p4 = por %p1522_p5, %p1521_p2 }
  0x1b   : > { %p1517_p1 = pneg %p1516_p0 }
  0x1d   : > { %p1524_p3 = pnand %p1523_p4, %p1517_p1 }
  0x1f   : > { %1527 = shalt.err (!%p1524_p3)
}
  0x20   : > { %s1557_s11 = smov 64   ;;  %s1558_s12 = smov 4  }
  0x21   : > { %1428 = dma.hbm_to_vmem [thread:$0]  (!%p1628_p6), %s2084_s2, 1024, %s198_s26, [#allocation4], %s1557_s11, %s1557_s11, %s1558_s12  }
  0x22   : > { %p2094_p7 = scmp.ne.s32.totalorder %s2091_s23, 0 }
  0x23   : > { %p2095_p9 = scmp.ne.s32.totalorder (!%p2094_p7), %s2092_s24, 0 }
  0x24   : > { %216 = sbr.rel (%p2094_p7) target bundleno = 5779 (0x1693), region = 36 }
  0x2b   : > { %1541 = dma.done.wait (%p2095_p9), [#allocation4], 1024  }
  0x2c   : > { %1543 = vsyncadd (%p2095_p9), [#allocation4], 4294966272  ;;  %p1238_p4 = scmp.ne.s32.totalorder %s1546_s18, 0 }
  0x2d   : > { %v263_v0 = vld [vmem:[%s2082_s0] sm:$0xff] (!%p1238_p4)  ;;  %vm271_vm0 = vcmask (!%p1238_p4), 261120   ;;  %v264_v1 = vld [vmem:[%s2082_s0 + $0x8] sm:$0xff] (!%p1238_p4)  ;;  %v265_v2 = vld [vmem:[%s2082_s0 + $0x10] sm:$0xff] (!%p1238_p4)  ;;  %v1559_v6 = vmov (!%p1238_p4), 0.0  }
  0x2e   : > { %262 = sbr.rel (%p1238_p4) target bundleno = 54 (0x36), region = 44  ;;  %272 = vst.msk [vmem:[%s2086_s4] sm:$0xff] (!%p1238_p4), %vm271_vm0, %v263_v0  ;;  %273 = vst.msk [vmem:[%s2086_s4 + $0x8] sm:$0xff] (!%p1238_p4), %vm271_vm0, %v264_v1  ;;  %v266_v3 = vld [vmem:[%s2082_s0 + $0x18] sm:$0xff] (!%p1238_p4)  ;;  %v267_v4 = vld [vmem:[%s2082_s0 + $0x20] sm:$0xff] (!%p1238_p4) }
  0x2f   : > { %274 = vst.msk [vmem:[%s2086_s4 + $0x10] sm:$0xff] (!%p1238_p4), %vm271_vm0, %v265_v2  ;;  %v268_v5 = vld [vmem:[%s2082_s0 + $0x28] sm:$0xff] (!%p1238_p4)  ;;  %280 = vst.msk [vmem:[%s2087_s5] sm:$0xff] (!%p1238_p4), %vm271_vm0, %v1559_v6  ;;  %v269_v7 = vld [vmem:[%s2082_s0 + $0x30] sm:$0xff] (!%p1238_p4) }
  0x30   : > { %281 = vst.msk [vmem:[%s2087_s5 + $0x8] sm:$0xff] (!%p1238_p4), %vm271_vm0, %v1559_v6  ;;  %282 = vst.msk [vmem:[%s2087_s5 + $0x10] sm:$0xff] (!%p1238_p4), %vm271_vm0, %v1559_v6  ;;  %v270_v8 = vld [vmem:[%s2082_s0 + $0x38] sm:$0xff] (!%p1238_p4) }
  0x31   : > { %283 = vst.msk [vmem:[%s2087_s5 + $0x18] sm:$0xff] (!%p1238_p4), %vm271_vm0, %v1559_v6  ;;  %284 = vst.msk [vmem:[%s2087_s5 + $0x20] sm:$0xff] (!%p1238_p4), %vm271_vm0, %v1559_v6 }
  0x32   : > { %285 = vst.msk [vmem:[%s2087_s5 + $0x28] sm:$0xff] (!%p1238_p4), %vm271_vm0, %v1559_v6  ;;  %286 = vst.msk [vmem:[%s2087_s5 + $0x30] sm:$0xff] (!%p1238_p4), %vm271_vm0, %v1559_v6 }
  0x33   : > { %287 = vst.msk [vmem:[%s2087_s5 + $0x38] sm:$0xff] (!%p1238_p4), %vm271_vm0, %v1559_v6  ;;  %275 = vst.msk [vmem:[%s2086_s4 + $0x18] sm:$0xff] (!%p1238_p4), %vm271_vm0, %v266_v3 }
  0x34   : > { %276 = vst.msk [vmem:[%s2086_s4 + $0x20] sm:$0xff] (!%p1238_p4), %vm271_vm0, %v267_v4  ;;  %277 = vst.msk [vmem:[%s2086_s4 + $0x28] sm:$0xff] (!%p1238_p4), %vm271_vm0, %v268_v5 }
  0x35   : > { %278 = vst.msk [vmem:[%s2086_s4 + $0x30] sm:$0xff] %vm271_vm0, %v269_v7  ;;  %279 = vst.msk [vmem:[%s2086_s4 + $0x38] sm:$0xff] %vm271_vm0, %v270_v8 }
  0x36 PF: > { %s1290_s26 = sshll.u32 %s1546_s18, 4  ;;  %v1747_v9 = vld [vmem:[%s2086_s4] sm:$0xff]  ;;  %v1752_v10 = vld [vmem:[%s2086_s4 + $0x8] sm:$0xff]  ;;  %vm333_vm1 = vcmask 261120   ;;  %v1560_v12 = vmov 0.0   ;;  %vm1561_vm2 = vmmov 0   ;;  %s301_s15 = scalar_lea.vmem %s2085_s3, %s1546_s18  ;;  %v427_v36 = vlaneseq }
  0x37   : > { %s290_s7 = scalar_lea.vmem %s2083_s1, %s1290_s26  ;;  %v311_v11 = vpack.c.bf16 %v1752_v10, %v1747_v9  ;;  %1357 = vmatprep.subr.bf16.mxu1 %v1560_v12  ;;  %s296_s8 = scalar_lea.vmem [#allocation3], %s1290_s26  ;;  %1361 = vmatprep.mubr.msk.bf16.mxu1 %vm1561_vm2, %v1560_v12  ;;  %v1771_v17 = vld [vmem:[%s2086_s4 + $0x10] sm:$0xff]  ;;  %v1562_v20 = vmov 0   ;;  %v1799_v23 = vld [vmem:[%s301_s15] ss:$0 sm:$0xff] }
  0x38   : > { %v1464_v13 = vld [vmem:[%s290_s7] sm:$0xff]   ;;  %v1467_v15 = vld [vmem:[%s290_s7 + $0x8] sm:$0xff]   ;;  %v428_v37 = vand.u32 127, %v427_v36  ;;  %s1563_s18 = smov 64   ;;  %s1564_s16 = smov 32  }
  0x39   : > { %1349 = vmatprep.mubr.msk.bf16.mxu0 %vm333_vm1, %v311_v11  ;;  %v1763_v14 = vld [vmem:[%s296_s8] sm:$0xff]   ;;  %1345 = vmatprep.subr.bf16.mxu0 %v1464_v13  ;;  %v1765_v16 = vld [vmem:[%s296_s8 + $0x8] sm:$0xff]  }
  0x3a   : > { %1358 = vmatpush3.bf16.msra.mxu1 %v1763_v14  ;;  %1346 = vmatpush3.bf16.msra.mxu0 %v1464_v13  ;;  %vm429_vm3 = vcmp.ge.s32.totalorder %v428_v37, 64  ;;  %vm430_vm4 = vcmp.lt.s32.totalorder %v428_v37, 96 }
  0x3b   : > { %v1776_v18 = vld [vmem:[%s2086_s4 + $0x18] sm:$0xff]  ;;  %1359 = vmatprep.subr.bf16.mxu1 %v1560_v12  ;;  %1347 = vmatprep.subr.bf16.mxu0 %v1467_v15  ;;  %vm1805_vm5 = vmand %vm429_vm3, %vm430_vm4 }
  0x3c   : > { %v312_v19 = vpack.c.bf16 %v1776_v18, %v1771_v17 }
  0x3e   : > { %1360 = vmatpush3.bf16.msra.mxu1 %v1765_v16  ;;  %1348 = vmatpush3.bf16.msra.mxu0 %v1467_v15  ;;  %v1837_v15 = vld [vmem:[%s2086_s4 + $0x20] sm:$0xff] }
  0x3f   : > { %1365 = vmatprep.subr.bf16.mxu1 %v1560_v12  ;;  %1373 = vmatprep.subr.bf16.mxu0 %v1560_v12 }
  0x41   : > { %1362 = vmatmul.mubr.bf16.vlgmr.msra.gmra.mrb[0].mxu1 %v1562_v20  ;;  %1350 = vmatmul.mubr.msk.bf16.vlgmr.msra.gmra.mrb[0].mxu0 %vm333_vm1, %v312_v19  ;;  %v1842_v19 = vld [vmem:[%s2086_s4 + $0x28] sm:$0xff]  ;;  %v1847_v20 = vld [vmem:[%s2086_s4 + $0x30] sm:$0xff] }
  0x42   : > { %1366 = vmatpush3.bf16.msra.mxu1 %v1763_v14  ;;  %1369 = vmatprep.mubr.msk.bf16.mxu1 %vm1561_vm2, %v1560_v12 }
  0x43   : > { %1367 = vmatprep.subr.bf16.mxu1 %v1560_v12  ;;  %1374 = vmatpush3.bf16.msra.mxu0 %v1763_v14 }
  0x44   : > { %1375 = vmatprep.subr.bf16.mxu0 %v1560_v12 }
  0x46   : > { %1368 = vmatpush3.bf16.msra.mxu1 %v1765_v16 }
  0x47   : > { %1381 = vmatprep.subr.bf16.mxu1 %v1560_v12  ;;  %1376 = vmatpush3.bf16.msra.mxu0 %v1765_v16 }
  0x48   : > { %1389 = vmatprep.subr.bf16.mxu0 %v1560_v12 }
 0x114   : > { %v481_v21 = vpop.f32.mrb[0].mxu1  ;;  %v1351_v22 = vpop.f32.mrb[0].mxu0 }
 0x115   : > { %v1363_v24 = vpop.f32.mrb[1].mxu1  ;;  %v380_v25 = vpop.f32.mrb[1].mxu0  ;;  %v389_v29 = vadd.f32 %v1351_v22, %v1799_v23  ;;  %v1854_v22 = vld [vmem:[%s2086_s4 + $0x38] sm:$0xff] }
 0x116   : > { %v484_v26 = vpop.f32.mrb[2].mxu1  ;;  %v1352_v27 = vpop.f32.mrb[2].mxu0  ;;  %v381_v32 = vadd.f32 %v1799_v23, %v380_v25  ;;  %v314_v24 = vpack.c.bf16 %v1854_v22, %v1847_v20 }
 0x117   : > { %v1364_v28 = vpop.f32.mrb[3].mxu1  ;;  %v392_v30 = vadd.f32 %v1352_v27, %v1799_v23  ;;  %v383_v31 = vpop.f32.mrb[3].mxu0 }
 0x118   : > { %v384_v33 = vadd.f32 %v1799_v23, %v383_v31 }
 0x119   : > { %v1300_v34 = vpack.c.bf16 %v392_v30, %v389_v29 }
 0x11a   : > { %v1295_v35 = vpack.c.bf16 %v384_v33, %v381_v32 }
 0x11b   : > { %1312 = vst [vmem:[#allocation2 + $0x8] sm:$0xff] %v1300_v34  }
 0x11c   : > { %1296 = vst [vmem:[#allocation2] sm:$0xff] %v1295_v35  }
 0x123   : > { %v487_v38 = vld [vmem:[#allocation2] sm:$0xff]  }
 0x124   : > { %v488_v39 = vunpack.c.l.bf16 %v487_v38  ;;  %v572_v58 = vunpack.c.h.bf16 %v487_v38 }
 0x126   : > { %v489_v40 = vadd.f32 %v488_v39, %v481_v21  ;;  %v313_v21 = vpack.c.bf16 %v1842_v19, %v1837_v15 }
 0x128   : > { %v490_v42 = vmul.f32 0.5, %v489_v40  ;;  %1353 = vmatprep.mubr.msk.bf16.mxu0 %vm333_vm1, %v313_v21 }
 0x129   : > { %1354 = vmatmul.mubr.msk.bf16.gmra.mrb[4].mxu0 %vm333_vm1, %v314_v24 }
 0x12a   : > { %v491_v43 = vsel %vm1805_vm5, %v489_v40, %v490_v42  ;;  %1377 = vmatprep.mubr.msk.bf16.mxu0 %vm1561_vm2, %v1560_v12  ;;  %v657_v40 = vld [vmem:[#allocation2 + $0x8] sm:$0xff]  }
 0x12b   : > { %1468 = vtanh.f32 %v491_v43 }
 0x135   : > { %v1469_v44 = vpop.eup %1468 }
 0x136   : > { %v493_v45 = vadd.f32 1.0, %v1469_v44 }
 0x138   : > { %v494_v46 = vmul.f32 0.5, %v493_v45 }
 0x13a   : > { %v495_v47 = vsel %vm1805_vm5, %v1469_v44, %v494_v46 }
 0x13b   : > { %498 = vrot.lane.b32.xlu0 %v495_v47, %s1563_s18  ;;  %v496_v50 = vmul.f32 0.0, %v495_v47 }
 0x1ad   : > { %v499_v48 = vpop.permute.xlu0 %498 }
 0x1ae   : > { %v501_v49 = vmul.f32 %v499_v48, %v495_v47 }
 0x1b0   : > { %503 = vrot.lane.b32.xlu0 %v501_v49, %s1564_s16 }
 0x1fc   : > { %v1355_v29 = vpop.f32.mrb[4].mxu0 }
 0x1fd   : > { %v405_v30 = vadd.f32 %v1355_v29, %v1799_v23  ;;  %v396_v31 = vpop.f32.mrb[5].mxu0 }
 0x1fe   : > { %v397_v32 = vadd.f32 %v1799_v23, %v396_v31  ;;  %v1356_v33 = vpop.f32.mrb[6].mxu0 }
 0x1ff   : > { %v408_v34 = vadd.f32 %v1356_v33, %v1799_v23  ;;  %v399_v35 = vpop.f32.mrb[7].mxu0 }
 0x200   : > { %v400_v36 = vadd.f32 %v1799_v23, %v399_v35  ;;  %v658_v23 = vunpack.c.l.bf16 %v657_v40 }
 0x201   : > { %v1310_v37 = vpack.c.bf16 %v408_v34, %v405_v30 }
 0x202   : > { %v1305_v38 = vpack.c.bf16 %v400_v36, %v397_v32 }
 0x203   : > { %1314 = vst [vmem:[#allocation2 + $0x18] sm:$0xff] %v1310_v37  }
 0x204   : > { %1313 = vst [vmem:[#allocation2 + $0x10] sm:$0xff] %v1305_v38  }
 0x20b   : > { %v829_v35 = vld [vmem:[#allocation2 + $0x10] sm:$0xff]  }
 0x20c   : > { %v830_v36 = vunpack.c.l.bf16 %v829_v35 }
 0x222   : > { %v504_v51 = vpop.permute.xlu0 %503 }
 0x223   : > { %v506_v52 = vadd.f32 %v504_v51, %v496_v50 }
 0x225   : > { %1470 = vtanh.f32 %v506_v52 }
 0x22f   : > { %v1471_v53 = vpop.eup %1470 }
 0x230   : > { %509 = vrot.lane.b32.xlu1 %v1471_v53, %s1563_s18 }
 0x2a2   : > { %v510_v54 = vpop.permute.xlu1 %509 }
 0x2a3   : > { %v1816_v55 = vmul.f32 %v510_v54, %v495_v47 }
 0x2a5   : > { %v523_v56 = vpack.c.bf16 %v1816_v55, %v1816_v55 }
 0x2a7   : > { %525 = vrot.lane.b32.xlu1 %v523_v56, %s1564_s16 }
 0x319   : > { %v526_v57 = vpop.permute.xlu1 %525 }
 0x31a   : > { %1370 = vmatmul.mubr.msk.bf16.vlgmr.msra.gmra.mrb[4].mxu1 %vm333_vm1, %v526_v57 }
 0x31b   : > { %1382 = vmatpush3.bf16.msra.mxu1 %v1763_v14  ;;  %1385 = vmatprep.mubr.msk.bf16.mxu1 %vm1561_vm2, %v1560_v12 }
 0x31c   : > { %1383 = vmatprep.subr.bf16.mxu1 %v1560_v12 }
 0x31f   : > { %1384 = vmatpush3.bf16.msra.mxu1 %v1765_v16 }
 0x320   : > { %1397 = vmatprep.subr.bf16.mxu1 %v1560_v12 }
 0x3ed   : > { %v564_v59 = vpop.f32.mrb[4].mxu1 }
 0x3ee   : > { %v573_v60 = vadd.f32 %v572_v58, %v564_v59  ;;  %v1371_v61 = vpop.f32.mrb[5].mxu1 }
 0x3ef   : > { %v567_v62 = vpop.f32.mrb[6].mxu1 }
 0x3f0   : > { %v574_v63 = vmul.f32 0.5, %v573_v60  ;;  %v1372_v0 = vpop.f32.mrb[7].mxu1 }
 0x3f1   : > { %v744_v0 = vunpack.c.h.bf16 %v657_v40 }
 0x3f2   : > { %v575_v1 = vsel %vm1805_vm5, %v573_v60, %v574_v63 }
 0x3f3   : > { %1472 = vtanh.f32 %v575_v1 }
 0x3fd   : > { %v1473_v2 = vpop.eup %1472 }
 0x3fe   : > { %v577_v3 = vadd.f32 1.0, %v1473_v2 }
 0x400   : > { %v578_v4 = vmul.f32 0.5, %v577_v3 }
 0x402   : > { %v579_v5 = vsel %vm1805_vm5, %v1473_v2, %v578_v4 }
 0x403   : > { %582 = vrot.lane.b32.xlu0 %v579_v5, %s1563_s18  ;;  %v580_v8 = vmul.f32 %v579_v5, %v506_v52 }
 0x475   : > { %v583_v6 = vpop.permute.xlu0 %582 }
 0x476   : > { %v585_v7 = vmul.f32 %v583_v6, %v579_v5 }
 0x478   : > { %587 = vrot.lane.b32.xlu1 %v585_v7, %s1564_s16 }
 0x4ea   : > { %v588_v11 = vpop.permute.xlu1 %587 }
 0x4eb   : > { %v590_v13 = vadd.f32 %v588_v11, %v580_v8 }
 0x4ed   : > { %1474 = vtanh.f32 %v590_v13 }
 0x4f7   : > { %v1475_v25 = vpop.eup %1474 }
 0x4f8   : > { %593 = vrot.lane.b32.xlu0 %v1475_v25, %s1563_s18 }
 0x56a   : > { %v594_v26 = vpop.permute.xlu0 %593 }
 0x56b   : > { %v1863_v27 = vmul.f32 %v594_v26, %v579_v5 }
 0x56d   : > { %v609_v28 = vpack.c.bf16 %v1863_v27, %v1863_v27 }
 0x56f   : > { %611 = vrot.lane.b32.xlu1 %v609_v28, %s1564_s16 }
 0x5e1   : > { %v612_v39 = vpop.permute.xlu1 %611 }
 0x5e2   : > { %1378 = vmatmul.mubr.msk.bf16.vlgmr.msra.gmra.mrb[8].mxu0 %vm333_vm1, %v612_v39 }
 0x5e3   : > { %1390 = vmatpush3.bf16.msra.mxu0 %v1763_v14  ;;  %1393 = vmatprep.mubr.msk.bf16.mxu0 %vm1561_vm2, %v1560_v12 }
 0x5e4   : > { %1391 = vmatprep.subr.bf16.mxu0 %v1560_v12 }
 0x5e7   : > { %1392 = vmatpush3.bf16.msra.mxu0 %v1765_v16 }
 0x5e8   : > { %1405 = vmatprep.subr.bf16.mxu0 %v1560_v12 }
 0x6b5   : > { %v650_v42 = vpop.f32.mrb[8].mxu0 }
 0x6b6   : > { %v659_v43 = vadd.f32 %v658_v23, %v650_v42  ;;  %v1379_v44 = vpop.f32.mrb[9].mxu0 }
 0x6b7   : > { %v653_v45 = vpop.f32.mrb[10].mxu0 }
 0x6b8   : > { %v660_v46 = vmul.f32 0.5, %v659_v43  ;;  %v1380_v47 = vpop.f32.mrb[11].mxu0 }
 0x6ba   : > { %v661_v48 = vsel %vm1805_vm5, %v659_v43, %v660_v46 }
 0x6bb   : > { %1476 = vtanh.f32 %v661_v48 }
 0x6c5   : > { %v1477_v49 = vpop.eup %1476 }
 0x6c6   : > { %v663_v50 = vadd.f32 1.0, %v1477_v49 }
 0x6c8   : > { %v664_v51 = vmul.f32 0.5, %v663_v50 }
 0x6ca   : > { %v665_v52 = vsel %vm1805_vm5, %v1477_v49, %v664_v51 }
 0x6cb   : > { %668 = vrot.lane.b32.xlu0 %v665_v52, %s1563_s18  ;;  %v666_v56 = vmul.f32 %v665_v52, %v590_v13 }
 0x73d   : > { %v669_v53 = vpop.permute.xlu0 %668 }
 0x73e   : > { %v671_v54 = vmul.f32 %v669_v53, %v665_v52 }
 0x740   : > { %673 = vrot.lane.b32.xlu1 %v671_v54, %s1564_s16 }
 0x7b2   : > { %v674_v57 = vpop.permute.xlu1 %673 }
 0x7b3   : > { %v676_v58 = vadd.f32 %v674_v57, %v666_v56 }
 0x7b5   : > { %1478 = vtanh.f32 %v676_v58 }
 0x7bf   : > { %v1479_v59 = vpop.eup %1478 }
 0x7c0   : > { %679 = vrot.lane.b32.xlu0 %v1479_v59, %s1563_s18  ;;  %v916_v59 = vunpack.c.h.bf16 %v829_v35 }
 0x832   : > { %v680_v60 = vpop.permute.xlu0 %679 }
 0x833   : > { %v1886_v61 = vmul.f32 %v680_v60, %v665_v52 }
 0x835   : > { %v695_v62 = vpack.c.bf16 %v1886_v61, %v1886_v61 }
 0x837   : > { %697 = vrot.lane.b32.xlu1 %v695_v62, %s1564_s16 }
 0x8a9   : > { %v698_v63 = vpop.permute.xlu1 %697 }
 0x8aa   : > { %1386 = vmatmul.mubr.msk.bf16.vlgmr.msra.gmra.mrb[8].mxu1 %vm333_vm1, %v698_v63 }
 0x8ab   : > { %1398 = vmatpush3.bf16.msra.mxu1 %v1763_v14  ;;  %1401 = vmatprep.mubr.msk.bf16.mxu1 %vm1561_vm2, %v1560_v12 }
 0x8ac   : > { %1399 = vmatprep.subr.bf16.mxu1 %v1560_v12 }
 0x8af   : > { %1400 = vmatpush3.bf16.msra.mxu1 %v1765_v16 }
 0x8b0   : > { %1413 = vmatprep.subr.bf16.mxu1 %v1560_v12 }
 0x97d   : > { %v736_v1 = vpop.f32.mrb[8].mxu1 }
 0x97e   : > { %v745_v2 = vadd.f32 %v744_v0, %v736_v1  ;;  %v1387_v3 = vpop.f32.mrb[9].mxu1 }
 0x97f   : > { %v739_v4 = vpop.f32.mrb[10].mxu1 }
 0x980   : > { %v746_v5 = vmul.f32 0.5, %v745_v2  ;;  %v1388_v6 = vpop.f32.mrb[11].mxu1 }
 0x982   : > { %v747_v7 = vsel %vm1805_vm5, %v745_v2, %v746_v5 }
 0x983   : > { %1480 = vtanh.f32 %v747_v7 }
 0x98d   : > { %v1481_v8 = vpop.eup %1480 }
 0x98e   : > { %v749_v11 = vadd.f32 1.0, %v1481_v8 }
 0x990   : > { %v750_v13 = vmul.f32 0.5, %v749_v11 }
 0x992   : > { %v751_v21 = vsel %vm1805_vm5, %v1481_v8, %v750_v13 }
 0x993   : > { %754 = vrot.lane.b32.xlu0 %v751_v21, %s1563_s18  ;;  %v752_v26 = vmul.f32 %v751_v21, %v676_v58 }
 0xa05   : > { %v755_v24 = vpop.permute.xlu0 %754 }
 0xa06   : > { %v757_v25 = vmul.f32 %v755_v24, %v751_v21 }
 0xa08   : > { %759 = vrot.lane.b32.xlu1 %v757_v25, %s1564_s16 }
 0xa7a   : > { %v760_v28 = vpop.permute.xlu1 %759 }
 0xa7b   : > { %v762_v29 = vadd.f32 %v760_v28, %v752_v26  ;;  %v1001_v28 = vld [vmem:[#allocation2 + $0x18] sm:$0xff]  }
 0xa7d   : > { %1482 = vtanh.f32 %v762_v29 }
 0xa87   : > { %v1483_v30 = vpop.eup %1482 }
 0xa88   : > { %765 = vrot.lane.b32.xlu0 %v1483_v30, %s1563_s18 }
 0xafa   : > { %v766_v31 = vpop.permute.xlu0 %765 }
 0xafb   : > { %v1905_v32 = vmul.f32 %v766_v31, %v751_v21 }
 0xafd   : > { %v781_v33 = vpack.c.bf16 %v1905_v32, %v1905_v32 }
 0xaff   : > { %783 = vrot.lane.b32.xlu1 %v781_v33, %s1564_s16 }
 0xb71   : > { %v784_v34 = vpop.permute.xlu1 %783 }
 0xb72   : > { %1394 = vmatmul.mubr.msk.bf16.vlgmr.msra.gmra.mrb[12].mxu0 %vm333_vm1, %v784_v34 }
 0xb73   : > { %1406 = vmatpush3.bf16.msra.mxu0 %v1763_v14  ;;  %1409 = vmatprep.mubr.msk.bf16.mxu0 %vm1561_vm2, %v1560_v12 }
 0xb74   : > { %1407 = vmatprep.subr.bf16.mxu0 %v1560_v12 }
 0xb77   : > { %1408 = vmatpush3.bf16.msra.mxu0 %v1765_v16 }
 0xc45   : > { %v822_v37 = vpop.f32.mrb[12].mxu0 }
 0xc46   : > { %v831_v38 = vadd.f32 %v830_v36, %v822_v37  ;;  %v1395_v39 = vpop.f32.mrb[13].mxu0 }
 0xc47   : > { %v825_v40 = vpop.f32.mrb[14].mxu0 }
 0xc48   : > { %v832_v23 = vmul.f32 0.5, %v831_v38  ;;  %v1396_v42 = vpop.f32.mrb[15].mxu0 }
 0xc4a   : > { %v833_v43 = vsel %vm1805_vm5, %v831_v38, %v832_v23 }
 0xc4b   : > { %1484 = vtanh.f32 %v833_v43 }
 0xc55   : > { %v1485_v44 = vpop.eup %1484 }
 0xc56   : > { %v835_v45 = vadd.f32 1.0, %v1485_v44 }
 0xc58   : > { %v836_v46 = vmul.f32 0.5, %v835_v45 }
 0xc5a   : > { %v837_v47 = vsel %vm1805_vm5, %v1485_v44, %v836_v46 }
 0xc5b   : > { %840 = vrot.lane.b32.xlu0 %v837_v47, %s1563_s18  ;;  %v838_v50 = vmul.f32 %v837_v47, %v762_v29  ;;  %v1002_v29 = vunpack.c.l.bf16 %v1001_v28 }
 0xccd   : > { %v841_v48 = vpop.permute.xlu0 %840 }
 0xcce   : > { %v843_v49 = vmul.f32 %v841_v48, %v837_v47 }
 0xcd0   : > { %845 = vrot.lane.b32.xlu1 %v843_v49, %s1564_s16 }
 0xd42   : > { %v846_v51 = vpop.permute.xlu1 %845 }
 0xd43   : > { %v848_v52 = vadd.f32 %v846_v51, %v838_v50 }
 0xd45   : > { %1486 = vtanh.f32 %v848_v52 }
 0xd4f   : > { %v1487_v53 = vpop.eup %1486 }
 0xd50   : > { %851 = vrot.lane.b32.xlu0 %v1487_v53, %s1563_s18 }
 0xdc2   : > { %v852_v54 = vpop.permute.xlu0 %851 }
 0xdc3   : > { %v1923_v56 = vmul.f32 %v852_v54, %v837_v47 }
 0xdc5   : > { %v867_v57 = vpack.c.bf16 %v1923_v56, %v1923_v56 }
 0xdc7   : > { %869 = vrot.lane.b32.xlu1 %v867_v57, %s1564_s16 }
 0xe39   : > { %v870_v58 = vpop.permute.xlu1 %869 }
 0xe3a   : > { %1402 = vmatmul.mubr.msk.bf16.vlgmr.msra.gmra.mrb[12].mxu1 %vm333_vm1, %v870_v58 }
 0xe3b   : > { %1414 = vmatpush3.bf16.msra.mxu1 %v1763_v14  ;;  %1417 = vmatprep.mubr.msk.bf16.mxu1 %vm1561_vm2, %v1560_v12 }
 0xe3c   : > { %1415 = vmatprep.subr.bf16.mxu1 %v1560_v12 }
 0xe3f   : > { %1416 = vmatpush3.bf16.msra.mxu1 %v1765_v16 }
 0xf0d   : > { %v908_v60 = vpop.f32.mrb[12].mxu1 }
 0xf0e   : > { %v917_v62 = vadd.f32 %v916_v59, %v908_v60  ;;  %v1403_v63 = vpop.f32.mrb[13].mxu1 }
 0xf0f   : > { %v911_v0 = vpop.f32.mrb[14].mxu1 }
 0xf10   : > { %v918_v1 = vmul.f32 0.5, %v917_v62  ;;  %v1404_v2 = vpop.f32.mrb[15].mxu1 }
 0xf12   : > { %v919_v3 = vsel %vm1805_vm5, %v917_v62, %v918_v1 }
 0xf13   : > { %1488 = vtanh.f32 %v919_v3 }
 0xf1d   : > { %v1489_v4 = vpop.eup %1488 }
 0xf1e   : > { %v921_v14 = vadd.f32 1.0, %v1489_v4 }
 0xf20   : > { %v922_v5 = vmul.f32 0.5, %v921_v14 }
 0xf22   : > { %v923_v6 = vsel %vm1805_vm5, %v1489_v4, %v922_v5 }
 0xf23   : > { %926 = vrot.lane.b32.xlu0 %v923_v6, %s1563_s18  ;;  %v924_v7 = vmul.f32 %v923_v6, %v848_v52  ;;  %v1088_v52 = vunpack.c.h.bf16 %v1001_v28 }
 0xf95   : > { %v927_v12 = vpop.permute.xlu0 %926 }
 0xf96   : > { %v929_v16 = vmul.f32 %v927_v12, %v923_v6 }
 0xf98   : > { %931 = vrot.lane.b32.xlu1 %v929_v16, %s1564_s16 }
0x100a   : > { %v932_v8 = vpop.permute.xlu1 %931 }
0x100b   : > { %v934_v11 = vadd.f32 %v932_v8, %v924_v7 }
0x100d   : > { %1490 = vtanh.f32 %v934_v11 }
0x1017   : > { %v1491_v13 = vpop.eup %1490 }
0x1018   : > { %937 = vrot.lane.b32.xlu0 %v1491_v13, %s1563_s18 }
0x108a   : > { %v938_v21 = vpop.permute.xlu0 %937 }
0x108b   : > { %v1941_v24 = vmul.f32 %v938_v21, %v923_v6  ;;  %v520_v6 = vld [vmem:[%s2087_s5] sm:$0xff] }
0x108d   : > { %v953_v25 = vpack.c.bf16 %v1941_v24, %v1941_v24 }
0x108f   : > { %955 = vrot.lane.b32.xlu1 %v953_v25, %s1564_s16  ;;  %v1279_v25 = vld [vmem:[%s2087_s5 + $0x30] sm:$0xff] }
0x1101   : > { %v956_v26 = vpop.permute.xlu1 %955 }
0x1102   : > { %1410 = vmatmul.mubr.msk.bf16.vlgmr.msra.gmra.mrb[16].mxu0 %vm333_vm1, %v956_v26 }
0x11d5   : > { %v994_v30 = vpop.f32.mrb[16].mxu0 }
0x11d6   : > { %v1003_v31 = vadd.f32 %v1002_v29, %v994_v30  ;;  %v1411_v33 = vpop.f32.mrb[17].mxu0 }
0x11d7   : > { %v997_v34 = vpop.f32.mrb[18].mxu0 }
0x11d8   : > { %v1004_v35 = vmul.f32 0.5, %v1003_v31  ;;  %v1412_v36 = vpop.f32.mrb[19].mxu0  ;;  %v1264_v34 = vld [vmem:[%s2087_s5 + $0x18] sm:$0xff] }
0x11da   : > { %v1005_v37 = vsel %vm1805_vm5, %v1003_v31, %v1004_v35 }
0x11db   : > { %1492 = vtanh.f32 %v1005_v37 }
0x11e5   : > { %v1493_v38 = vpop.eup %1492 }
0x11e6   : > { %v1007_v39 = vadd.f32 1.0, %v1493_v38 }
0x11e8   : > { %v1008_v40 = vmul.f32 0.5, %v1007_v39 }
0x11ea   : > { %v1009_v23 = vsel %vm1805_vm5, %v1493_v38, %v1008_v40 }
0x11eb   : > { %1012 = vrot.lane.b32.xlu0 %v1009_v23, %s1563_s18  ;;  %v1010_v44 = vmul.f32 %v1009_v23, %v934_v11 }
0x125d   : > { %v1013_v42 = vpop.permute.xlu0 %1012 }
0x125e   : > { %v1015_v43 = vmul.f32 %v1013_v42, %v1009_v23 }
0x1260   : > { %1017 = vrot.lane.b32.xlu1 %v1015_v43, %s1564_s16 }
0x12d2   : > { %v1018_v45 = vpop.permute.xlu1 %1017 }
0x12d3   : > { %v1020_v46 = vadd.f32 %v1018_v45, %v1010_v44 }
0x12d5   : > { %1494 = vtanh.f32 %v1020_v46 }
0x12df   : > { %v1495_v47 = vpop.eup %1494 }
0x12e0   : > { %1023 = vrot.lane.b32.xlu0 %v1495_v47, %s1563_s18 }
0x1352   : > { %v1024_v48 = vpop.permute.xlu0 %1023 }
0x1353   : > { %v1026_v49 = vmul.f32 %v1024_v48, %v1009_v23 }
0x1355   : > { %v1039_v50 = vpack.c.bf16 %v1026_v49, %v1026_v49 }
0x1357   : > { %1041 = vrot.lane.b32.xlu1 %v1039_v50, %s1564_s16 }
0x13c9   : > { %v1042_v51 = vpop.permute.xlu1 %1041 }
0x13ca   : > { %1418 = vmatmul.mubr.msk.bf16.vlgmr.msra.gmra.mrb[16].mxu1 %vm333_vm1, %v1042_v51 }
0x149d   : > { %v1080_v53 = vpop.f32.mrb[16].mxu1 }
0x149e   : > { %v1089_v54 = vadd.f32 %v1088_v52, %v1080_v53  ;;  %v1419_v57 = vpop.f32.mrb[17].mxu1 }
0x149f   : > { %v1083_v58 = vpop.f32.mrb[18].mxu1 }
0x14a0   : > { %v1090_v59 = vmul.f32 0.5, %v1089_v54  ;;  %v1420_v60 = vpop.f32.mrb[19].mxu1 }
0x14a2   : > { %v1091_v62 = vsel %vm1805_vm5, %v1089_v54, %v1090_v59 }
0x14a3   : > { %1496 = vtanh.f32 %v1091_v62 }
0x14ad   : > { %v1497_v63 = vpop.eup %1496 }
0x14ae   : > { %v1093_v0 = vadd.f32 1.0, %v1497_v63 }
0x14b0   : > { %v1094_v1 = vmul.f32 0.5, %v1093_v0 }
0x14b2   : > { %v1095_v2 = vsel %vm1805_vm5, %v1497_v63, %v1094_v1 }
0x14b3   : > { %1098 = vrot.lane.b32.xlu0 %v1095_v2, %s1563_s18  ;;  %v1096_v14 = vmul.f32 %v1095_v2, %v1020_v46 }
0x1525   : > { %v1099_v3 = vpop.permute.xlu0 %1098 }
0x1526   : > { %v1101_v4 = vmul.f32 %v1099_v3, %v1095_v2 }
0x1528   : > { %1103 = vrot.lane.b32.xlu1 %v1101_v4, %s1564_s16 }
0x152c   : > { %515 = vrot.lane.b32.xlu1 %v1816_v55, %s1564_s16 }
0x1530   : > { %686 = vrot.lane.b32.xlu1 %v1886_v61, %s1564_s16  ;;  %v1259_v61 = vld [vmem:[%s2087_s5 + $0x10] sm:$0xff] }
0x1534   : > { %858 = vrot.lane.b32.xlu1 %v1923_v56, %s1564_s16 }
0x1538   : > { %1030 = vrot.lane.b32.xlu1 %v1026_v49, %s1564_s16 }
0x159a   : > { %v1104_v41 = vpop.permute.xlu1 %1103 }
0x159b   : > { %v1106_v5 = vadd.f32 %v1104_v41, %v1096_v14 }
0x159d   : > { %1498 = vtanh.f32 %v1106_v5 }
0x159e   : > { %v516_v12 = vpop.permute.xlu1 %515 }
0x159f   : > { %v518_v16 = vsub.f32 %v1747_v9, %v516_v12  ;;  %v521_v55 = vadd.f32 %v520_v6, %v516_v12  ;;  %v1269_v9 = vld [vmem:[%s2087_s5 + $0x20] sm:$0xff] }
0x15a1   : > { %519 = vst.msk [vmem:[%s2086_s4] sm:$0xff] %vm333_vm1, %v518_v16  ;;  %522 = vst.msk [vmem:[%s2087_s5] sm:$0xff] %vm333_vm1, %v521_v55 }
0x15a2   : > { %v687_v56 = vpop.permute.xlu1 %686 }
0x15a3   : > { %v689_v7 = vsub.f32 %v1771_v17, %v687_v56  ;;  %v693_v8 = vadd.f32 %v1259_v61, %v687_v56 }
0x15a5   : > { %1258 = vst.msk [vmem:[%s2086_s4 + $0x10] sm:$0xff] %vm333_vm1, %v689_v7  ;;  %1260 = vst.msk [vmem:[%s2087_s5 + $0x10] sm:$0xff] %vm333_vm1, %v693_v8 }
0x15a6   : > { %v859_v11 = vpop.permute.xlu1 %858 }
0x15a7   : > { %v1499_v13 = vpop.eup %1498  ;;  %v861_v21 = vsub.f32 %v1837_v15, %v859_v11  ;;  %v865_v17 = vadd.f32 %v1269_v9, %v859_v11 }
0x15a8   : > { %1109 = vrot.lane.b32.xlu0 %v1499_v13, %s1563_s18 }
0x15a9   : > { %1268 = vst.msk [vmem:[%s2086_s4 + $0x20] sm:$0xff] %vm333_vm1, %v861_v21  ;;  %1270 = vst.msk [vmem:[%s2087_s5 + $0x20] sm:$0xff] %vm333_vm1, %v865_v17 }
0x15aa   : > { %v1031_v26 = vpop.permute.xlu1 %1030 }
0x15ab   : > { %v1033_v15 = vsub.f32 %v1847_v20, %v1031_v26  ;;  %v1037_v28 = vadd.f32 %v1279_v25, %v1031_v26 }
0x15ac   : > { %600 = vrot.lane.b32.xlu0 %v1863_v27, %s1564_s16  ;;  %v1254_v27 = vld [vmem:[%s2087_s5 + $0x8] sm:$0xff] }
0x15ad   : > { %1278 = vst.msk [vmem:[%s2086_s4 + $0x30] sm:$0xff] %vm333_vm1, %v1033_v15  ;;  %1280 = vst.msk [vmem:[%s2087_s5 + $0x30] sm:$0xff] %vm333_vm1, %v1037_v28 }
0x15b0   : > { %772 = vrot.lane.b32.xlu0 %v1905_v32, %s1564_s16 }
0x15b4   : > { %944 = vrot.lane.b32.xlu0 %v1941_v24, %s1564_s16 }
0x161a   : > { %v1110_v20 = vpop.permute.xlu0 %1109 }
0x161b   : > { %v1112_v29 = vmul.f32 %v1110_v20, %v1095_v2 }
0x161d   : > { %1116 = vrot.lane.b32.xlu0 %v1112_v29, %s1564_s16 }
0x161e   : > { %v601_v30 = vpop.permute.xlu0 %600 }
0x161f   : > { %v603_v31 = vsub.f32 %v1752_v10, %v601_v30  ;;  %v607_v33 = vadd.f32 %v1254_v27, %v601_v30  ;;  %v1274_v10 = vld [vmem:[%s2087_s5 + $0x28] sm:$0xff] }
0x1621   : > { %1253 = vst.msk [vmem:[%s2086_s4 + $0x8] sm:$0xff] %vm333_vm1, %v603_v31  ;;  %1255 = vst.msk [vmem:[%s2087_s5 + $0x8] sm:$0xff] %vm333_vm1, %v607_v33 }
0x1622   : > { %v773_v32 = vpop.permute.xlu0 %772 }
0x1623   : > { %v775_v24 = vsub.f32 %v1776_v18, %v773_v32  ;;  %v779_v35 = vadd.f32 %v1264_v34, %v773_v32  ;;  %v1284_v18 = vld [vmem:[%s2087_s5 + $0x38] sm:$0xff] }
0x1625   : > { %1263 = vst.msk [vmem:[%s2086_s4 + $0x18] sm:$0xff] %vm333_vm1, %v775_v24  ;;  %1265 = vst.msk [vmem:[%s2087_s5 + $0x18] sm:$0xff] %vm333_vm1, %v779_v35 }
0x1626   : > { %v945_v36 = vpop.permute.xlu0 %944 }
0x1627   : > { %v947_v37 = vsub.f32 %v1842_v19, %v945_v36  ;;  %v951_v38 = vadd.f32 %v1274_v10, %v945_v36 }
0x1629   : > { %1273 = vst.msk [vmem:[%s2086_s4 + $0x28] sm:$0xff] %vm333_vm1, %v947_v37  ;;  %1275 = vst.msk [vmem:[%s2087_s5 + $0x28] sm:$0xff] %vm333_vm1, %v951_v38 }
0x168f   : > { %v1117_v39 = vpop.permute.xlu0 %1116 }
0x1690   : > { %v1119_v40 = vsub.f32 %v1854_v22, %v1117_v39  ;;  %v1123_v23 = vadd.f32 %v1284_v18, %v1117_v39 }
0x1692   : > { %1283 = vst.msk [vmem:[%s2086_s4 + $0x38] sm:$0xff] %vm333_vm1, %v1119_v40  ;;  %1285 = vst.msk [vmem:[%s2087_s5 + $0x38] sm:$0xff] %vm333_vm1, %v1123_v23 }
0x1693 PF: > { %s17_s20 = sadd.s32 1, %s1554_s20   ;;  %s2098_s18 = smov %s1550_s19 }
0x1694   : > { %p14_p3 = scmp.ge.s32.totalorder %s17_s20, 6   ;;  %s2099_s19 = smov %s2101_s22 }
0x1696   :  { %16 = sbr.rel (!%p14_p3) target bundleno = 2 (0x2), region = 111 }
0x169d   :  { %1158 = vsyncpa [#allocation4], 1 }
0x169e   :  { %1160 = vsyncpa [#allocation4 + $0x1], 1 }

</bundles_post_ra>
